<compile_context>
chip_gen: v7x
topology: tpu7x:2x2x1
jax: 0.10.0
libtpu: 0.0.40
codegen_flags: <defaults>
</compile_context>

<pallas_src>
import functools

import jax
import jax.numpy as jnp
from jax import lax
from jax.experimental import pallas as pl
from jax.experimental.pallas import tpu as pltpu


def _mean_pool_conv_kernel(x_ref, w_ref, b_ref, o_ref, pad_ref, col_ref, *,
                           kernel_size, hp, wp, pad, cin, cout, nb, lpad,
                           lane_dense):
    """One grid step: nb images of the (N, Hp, 2, Wp, 2*Cin) packed input."""
    c0 = lpad - pad                      # physical column of logical padded col 0
    kkc = kernel_size * kernel_size * cin

    # ---- zero only the border strips of the padded scratch ------------------
    # The interior is fully overwritten for every image and nothing else ever
    # writes the borders.  Re-zeroed every step: safe under megacore sharding.
    if pad:
        zrow = jnp.zeros((pad, wp + 2 * pad, cin), dtype=pad_ref.dtype)
        zcol = jnp.zeros((hp + 2 * pad, pad, cin), dtype=pad_ref.dtype)
        pad_ref[0:pad, c0:c0 + wp + 2 * pad, :] = zrow                   # top
        pad_ref[pad + hp:2 * pad + hp, c0:c0 + wp + 2 * pad, :] = zrow   # bottom
        pad_ref[:, c0:lpad, :] = zcol                                    # left
        pad_ref[:, lpad + wp:lpad + wp + pad, :] = zcol                  # right

    for i in range(nb):
        # ---- 2x2 mean pool (f32 accumulation, VPU only) ----------------------
        x = x_ref[i].astype(jnp.float32)                    # (hp, 2, wp, 2*cin)
        vsum = x[:, 0] + x[:, 1]                            # even + odd rows
        pooled = (vsum[:, :, :cin] + vsum[:, :, cin:]) * 0.25   # (hp, wp, cin)

        # Sublane-aligned interior store (starts at physical column lpad).
        pad_ref[pad:pad + hp, lpad:lpad + wp, :] = pooled

        # ---- im2col: K*K shifted windows -> contiguous lane groups (bf16) ---
        # Plain strided copies; no per-window reshape/relayout.
        for kh in range(kernel_size):
            for kw in range(kernel_size):
                k = kh * kernel_size + kw
                win = pad_ref[kh:kh + hp, c0 + kw:c0 + kw + wp, :]
                col_ref[i, :, :, k * cin:(k + 1) * cin] = win.astype(col_ref.dtype)

    # Single reshape feeding the MXU (layout-free when wp % 8 == 0).
    patches = col_ref[...].reshape(nb * hp * wp, kkc)        # bf16

    if lane_dense:
        # W (cout, kkc) @ patches^T -> (cout, nb*hp*wp): lane-dense output store.
        out_t = lax.dot_general(w_ref[...], patches,
                                dimension_numbers=(((1,), (1,)), ((), ())),
                                preferred_element_type=jnp.float32)
        out_t = out_t + b_ref[...]                           # (cout, 1) broadcast
        for i in range(nb):
            o_ref[i] = out_t[:, i * hp * wp:(i + 1) * hp * wp].astype(o_ref.dtype)
    else:
        # Small cout: put the long (nb*hp*wp) axis on the MXU's streamed M dim,
        # then transpose each tiny (hp*wp, cout) slab in VMEM (XLU) so the HBM
        # store stays lane-dense (cout, hp*wp).
        out_s = lax.dot_general(patches, w_ref[...],
                                dimension_numbers=(((1,), (1,)), ((), ())),
                                preferred_element_type=jnp.float32)  # (nb*hp*wp, cout)
        for i in range(nb):
            blk = out_s[i * hp * wp:(i + 1) * hp * wp, :]
            o_ref[i] = (blk.T + b_ref[...]).astype(o_ref.dtype)


def mean_pool_conv_nhwc(x_nhwc, w_oihw, b, kernel_size, *, images_per_step=None):
    """MeanPoolConv forward, channels-last input.

    x_nhwc: (N, H, W, Cin) -> (N, Cout, H//2, W//2) (NCHW, matching PyTorch).
    Channels-last callers avoid the NCHW->NHWC transpose HBM pass entirely.
    """
    n, h, w, cin = x_nhwc.shape
    assert kernel_size % 2 == 1, "only odd 'same' kernel sizes are supported"
    assert h % 2 == 0 and w % 2 == 0, "H and W must be even for the 2x2 mean pool"
    hp, wp = h // 2, w // 2
    pad = (kernel_size - 1) // 2
    cout = w_oihw.shape[0]
    assert w_oihw.shape[1] == cin
    kkc = kernel_size * kernel_size * cin
    lpad = 8 if pad else 0               # over-allocated left pad => aligned store

    # Images per grid step: fill the MXU / amortize per-step overhead on small
    # configs; stay at 1 when per-image VMEM is already large.
    if images_per_step is None:
        per_image_bytes = (hp * 2 * wp * 2 * cin) * x_nhwc.dtype.itemsize \
            + hp * wp * kkc * 2 + cout * hp * wp * 4
        nb = 1
        for cand in (8, 4, 2):
            if n % cand == 0 and cand * per_image_bytes <= 4 * 1024 * 1024:
                nb = cand
                break
    else:
        nb = images_per_step
    assert n % nb == 0

    # Free row-major reshape: (N, H, W, Cin) -> (N, Hp, 2, Wp, 2*Cin); the H
    # parity lands on axis 2 and (W parity, Cin) packs on the lane axis.
    x = x_nhwc.reshape(n, hp, 2, wp, 2 * cin)

    # Weight as one im2col matrix (Cout, K*K*Cin) with (kh, kw, ci) ordering to
    # match the patch columns; bf16 MXU operands, f32 accumulation.
    w_t = jnp.transpose(w_oihw, (0, 2, 3, 1)).reshape(cout, kkc).astype(jnp.bfloat16)
    b_col = b.reshape(cout, 1).astype(jnp.float32)

    lane_dense = cout >= 128

    kernel = functools.partial(
        _mean_pool_conv_kernel, kernel_size=kernel_size, hp=hp, wp=wp, pad=pad,
        cin=cin, cout=cout, nb=nb, lpad=lpad, lane_dense=lane_dense)

    # TODO(synk): for real GoodGenerator channel counts on v7x, add a Cout grid
    # axis and mark the grid-invariant weight/bias specs pipeline_mode=
    # pl.Buffered(1) to cut per-step VMEM; unnecessary at these demo sizes.
    out = pl.pallas_call(
        kernel,
        out_shape=jax.ShapeDtypeStruct((n, cout, hp * wp), x_nhwc.dtype),
        grid_spec=pltpu.PrefetchScalarGridSpec(
            num_scalar_prefetch=0,
            grid=(n // nb,),
            in_specs=[
                pl.BlockSpec((nb, hp, 2, wp, 2 * cin),
                             lambda i: (i, 0, 0, 0, 0)),
                pl.BlockSpec((cout, kkc), lambda i: (0, 0)),
                pl.BlockSpec((cout, 1), lambda i: (0, 0)),
            ],
            out_specs=pl.BlockSpec((nb, cout, hp * wp), lambda i: (i, 0, 0)),
            scratch_shapes=[
                pltpu.VMEM((hp + 2 * pad, lpad + wp + pad, cin), jnp.float32),
                pltpu.VMEM((nb, hp, wp, kkc), jnp.bfloat16),
            ],
        ),
        compiler_params=pltpu.CompilerParams(
            dimension_semantics=("parallel",),
            vmem_limit_bytes=64 * 1024 * 1024),
    )(x, w_t, b_col)

    # (N, Cout, Hp*Wp) -> NCHW with a free reshape (no output transpose pass).
    return out.reshape(n, cout, hp, wp)


def mean_pool_conv(x_nchw, w_oihw, b, kernel_size, **kw):
    """NCHW entry point (PyTorch layout): (N, Cin, H, W) -> (N, Cout, H/2, W/2)."""
    # TODO(synk): on HBM-bound v5e, feed activations NHWC (optionally bf16) to
    # skip this extra read+write of the activation tensor.
    x_nhwc = jnp.transpose(x_nchw, (0, 2, 3, 1))
    return mean_pool_conv_nhwc(x_nhwc, w_oihw, b, kernel_size, **kw)


def mean_pool_conv_ref(x_nchw, w_oihw, b, kernel_size):
    """Pure-JAX reference with the exact PyTorch MeanPoolConv semantics (NCHW)."""
    pad = (kernel_size - 1) // 2
    pooled = (x_nchw[:, :, ::2, ::2] + x_nchw[:, :, 1::2, ::2]
              + x_nchw[:, :, ::2, 1::2] + x_nchw[:, :, 1::2, 1::2]) / 4.0
    out = lax.conv_general_dilated(
        pooled, w_oihw, window_strides=(1, 1),
        padding=((pad, pad), (pad, pad)),
        dimension_numbers=("NCHW", "OIHW", "NCHW"),
        precision=lax.Precision.HIGHEST)
    return out + b.reshape(1, -1, 1, 1)


if __name__ == "__main__":
    N, Cin, Cout, H, W, K = 2, 4, 8, 16, 16, 3

    key = jax.random.PRNGKey(0)
    kx, kw, kb = jax.random.split(key, 3)
    x = jax.random.normal(kx, (N, Cin, H, W), dtype=jnp.float32)
    # Deterministic He-style init matching nn.Conv2d parameter shapes
    # (weight: (Cout, Cin, K, K), bias: (Cout,)).
    fan_in = Cin * K * K
    w = jax.random.normal(kw, (Cout, Cin, K, K), dtype=jnp.float32) \
        * (2.0 / fan_in) ** 0.5
    b = jax.random.normal(kb, (Cout,), dtype=jnp.float32) * 0.1

    out = mean_pool_conv(x, w, b, K)
    out = jax.block_until_ready(out)

    ref = mean_pool_conv_ref(x, w, b, K)
    assert out.shape == (N, Cout, H // 2, W // 2), out.shape
    # bf16 MXU operands with f32 accumulation vs HIGHEST-precision reference.
    assert jnp.allclose(out, ref, atol=2e-2, rtol=2e-2), \
        float(jnp.max(jnp.abs(out - ref)))

    print("KERNEL_OK")
</pallas_src>

<mosaic_0001>
module attributes {stable_mosaic.version = 11 : i64} {
  func.func @_mean_pool_conv_kernel(%arg0: i32, %arg1: memref<2x8x2x8x8xf32, #tpu.memory_space<vmem>>, %arg2: memref<8x36xbf16, #tpu.memory_space<vmem>>, %arg3: memref<8x1xf32, #tpu.memory_space<vmem>>, %arg4: memref<2x8x64xf32, #tpu.memory_space<vmem>>, %arg5: memref<10x17x4xf32, #tpu.memory_space<vmem>>, %arg6: memref<2x8x8x36xbf16, #tpu.memory_space<vmem>>) attributes {dimension_semantics = [#tpu.dimension_semantics<parallel>], iteration_bounds = array<i64: 1>, scalar_prefetch = 0 : i64, scratch_operands = 2 : i64, tpu.core_type = #tpu.core_type<tc>, window_params = [{transform_indices = @transform_0, window_bounds = array<i64: 2, 8, 2, 8, 8>}, {pipeline_mode = #tpu.pipeline_mode<synchronous>, transform_indices = @transform_1, window_bounds = array<i64: 8, 36>}, {pipeline_mode = #tpu.pipeline_mode<synchronous>, transform_indices = @transform_2, window_bounds = array<i64: 8, 1>}, {transform_indices = @transform_3, window_bounds = array<i64: 2, 8, 64>}]} {
    %cst = arith.constant 0.000000e+00 : f32
    %0 = vector.broadcast %cst : f32 to vector<1x10x4xf32>
    %cst_0 = arith.constant 0.000000e+00 : f32
    %1 = vector.broadcast %cst_0 : f32 to vector<10x1x4xf32>
    %c0 = arith.constant 0 : index
    %c7 = arith.constant 7 : index
    %c0_1 = arith.constant 0 : index
    %2 = vector.load %arg5[%c0, %c7, %c0_1] : memref<10x17x4xf32, #tpu.memory_space<vmem>>, vector<1x10x4xf32>
    tpu.vector_store %arg5[%c0, %c7, %c0_1], %0 {strides = array<i32>} : memref<10x17x4xf32, #tpu.memory_space<vmem>>, vector<1x10x4xf32>,
    %c9 = arith.constant 9 : index
    %c7_2 = arith.constant 7 : index
    %c0_3 = arith.constant 0 : index
    %3 = vector.load %arg5[%c9, %c7_2, %c0_3] : memref<10x17x4xf32, #tpu.memory_space<vmem>>, vector<1x10x4xf32>
    tpu.vector_store %arg5[%c9, %c7_2, %c0_3], %0 {strides = array<i32>} : memref<10x17x4xf32, #tpu.memory_space<vmem>>, vector<1x10x4xf32>,
    %c0_4 = arith.constant 0 : index
    %c7_5 = arith.constant 7 : index
    %c0_6 = arith.constant 0 : index
    %4 = vector.load %arg5[%c0_4, %c7_5, %c0_6] : memref<10x17x4xf32, #tpu.memory_space<vmem>>, vector<10x1x4xf32>
    tpu.vector_store %arg5[%c0_4, %c7_5, %c0_6], %1 {strides = array<i32>} : memref<10x17x4xf32, #tpu.memory_space<vmem>>, vector<10x1x4xf32>,
    %c0_7 = arith.constant 0 : index
    %c16 = arith.constant 16 : index
    %c0_8 = arith.constant 0 : index
    %5 = vector.load %arg5[%c0_7, %c16, %c0_8] : memref<10x17x4xf32, #tpu.memory_space<vmem>>, vector<10x1x4xf32>
    tpu.vector_store %arg5[%c0_7, %c16, %c0_8], %1 {strides = array<i32>} : memref<10x17x4xf32, #tpu.memory_space<vmem>>, vector<10x1x4xf32>,
    %c0_9 = arith.constant 0 : index
    %c0_10 = arith.constant 0 : index
    %c0_11 = arith.constant 0 : index
    %c0_12 = arith.constant 0 : index
    %c0_13 = arith.constant 0 : index
    %6 = vector.load %arg1[%c0_9, %c0_10, %c0_11, %c0_12, %c0_13] : memref<2x8x2x8x8xf32, #tpu.memory_space<vmem>>, vector<1x8x2x8x8xf32>
    %7 = vector.shape_cast %6 : vector<1x8x2x8x8xf32> to vector<8x2x8x8xf32>
    %8 = vector.extract_strided_slice %7 {offsets = [0, 0, 0, 0], sizes = [8, 1, 8, 8], strides = [1, 1, 1, 1]} : vector<8x2x8x8xf32> to vector<8x1x8x8xf32>
    %9 = vector.shape_cast %8 : vector<8x1x8x8xf32> to vector<8x8x8xf32>
    %10 = vector.extract_strided_slice %7 {offsets = [0, 1, 0, 0], sizes = [8, 1, 8, 8], strides = [1, 1, 1, 1]} : vector<8x2x8x8xf32> to vector<8x1x8x8xf32>
    %11 = vector.shape_cast %10 : vector<8x1x8x8xf32> to vector<8x8x8xf32>
    %12 = arith.addf %9, %11 : vector<8x8x8xf32>
    %13 = vector.extract_strided_slice %12 {offsets = [0, 0, 0], sizes = [8, 8, 4], strides = [1, 1, 1]} : vector<8x8x8xf32> to vector<8x8x4xf32>
    %14 = vector.extract_strided_slice %12 {offsets = [0, 0, 4], sizes = [8, 8, 4], strides = [1, 1, 1]} : vector<8x8x8xf32> to vector<8x8x4xf32>
    %15 = arith.addf %13, %14 : vector<8x8x4xf32>
    %cst_14 = arith.constant 2.500000e-01 : f32
    %16 = vector.broadcast %cst_14 : f32 to vector<8x8x4xf32>
    %17 = arith.mulf %15, %16 : vector<8x8x4xf32>
    %c1 = arith.constant 1 : index
    %c8 = arith.constant 8 : index
    %c0_15 = arith.constant 0 : index
    %18 = vector.load %arg5[%c1, %c8, %c0_15] : memref<10x17x4xf32, #tpu.memory_space<vmem>>, vector<8x8x4xf32>
    tpu.vector_store %arg5[%c1, %c8, %c0_15], %17 {strides = array<i32>} : memref<10x17x4xf32, #tpu.memory_space<vmem>>, vector<8x8x4xf32>,
    %c0_16 = arith.constant 0 : index
    %c7_17 = arith.constant 7 : index
    %c0_18 = arith.constant 0 : index
    %19 = vector.load %arg5[%c0_16, %c7_17, %c0_18] : memref<10x17x4xf32, #tpu.memory_space<vmem>>, vector<8x8x4xf32>
    %20 = arith.truncf %19 : vector<8x8x4xf32> to vector<8x8x4xbf16>
    %c0_19 = arith.constant 0 : index
    %c0_20 = arith.constant 0 : index
    %c0_21 = arith.constant 0 : index
    %c0_22 = arith.constant 0 : index
    %21 = vector.load %arg6[%c0_19, %c0_20, %c0_21, %c0_22] : memref<2x8x8x36xbf16, #tpu.memory_space<vmem>>, vector<1x8x8x4xbf16>
    %22 = vector.shape_cast %21 : vector<1x8x8x4xbf16> to vector<8x8x4xbf16>
    %23 = vector.shape_cast %20 : vector<8x8x4xbf16> to vector<1x8x8x4xbf16>
    tpu.vector_store %arg6[%c0_19, %c0_20, %c0_21, %c0_22], %23 {strides = array<i32>} : memref<2x8x8x36xbf16, #tpu.memory_space<vmem>>, vector<1x8x8x4xbf16>,
    %c0_23 = arith.constant 0 : index
    %c8_24 = arith.constant 8 : index
    %c0_25 = arith.constant 0 : index
    %24 = vector.load %arg5[%c0_23, %c8_24, %c0_25] : memref<10x17x4xf32, #tpu.memory_space<vmem>>, vector<8x8x4xf32>
    %25 = arith.truncf %24 : vector<8x8x4xf32> to vector<8x8x4xbf16>
    %c0_26 = arith.constant 0 : index
    %c0_27 = arith.constant 0 : index
    %c0_28 = arith.constant 0 : index
    %c4 = arith.constant 4 : index
    %26 = vector.load %arg6[%c0_26, %c0_27, %c0_28, %c4] : memref<2x8x8x36xbf16, #tpu.memory_space<vmem>>, vector<1x8x8x4xbf16>
    %27 = vector.shape_cast %26 : vector<1x8x8x4xbf16> to vector<8x8x4xbf16>
    %28 = vector.shape_cast %25 : vector<8x8x4xbf16> to vector<1x8x8x4xbf16>
    tpu.vector_store %arg6[%c0_26, %c0_27, %c0_28, %c4], %28 {strides = array<i32>} : memref<2x8x8x36xbf16, #tpu.memory_space<vmem>>, vector<1x8x8x4xbf16>,
    %c0_29 = arith.constant 0 : index
    %c9_30 = arith.constant 9 : index
    %c0_31 = arith.constant 0 : index
    %29 = vector.load %arg5[%c0_29, %c9_30, %c0_31] : memref<10x17x4xf32, #tpu.memory_space<vmem>>, vector<8x8x4xf32>
    %30 = arith.truncf %29 : vector<8x8x4xf32> to vector<8x8x4xbf16>
    %c0_32 = arith.constant 0 : index
    %c0_33 = arith.constant 0 : index
    %c0_34 = arith.constant 0 : index
    %c8_35 = arith.constant 8 : index
    %31 = vector.load %arg6[%c0_32, %c0_33, %c0_34, %c8_35] : memref<2x8x8x36xbf16, #tpu.memory_space<vmem>>, vector<1x8x8x4xbf16>
    %32 = vector.shape_cast %31 : vector<1x8x8x4xbf16> to vector<8x8x4xbf16>
    %33 = vector.shape_cast %30 : vector<8x8x4xbf16> to vector<1x8x8x4xbf16>
    tpu.vector_store %arg6[%c0_32, %c0_33, %c0_34, %c8_35], %33 {strides = array<i32>} : memref<2x8x8x36xbf16, #tpu.memory_space<vmem>>, vector<1x8x8x4xbf16>,
    %c1_36 = arith.constant 1 : index
    %c7_37 = arith.constant 7 : index
    %c0_38 = arith.constant 0 : index
    %34 = vector.load %arg5[%c1_36, %c7_37, %c0_38] : memref<10x17x4xf32, #tpu.memory_space<vmem>>, vector<8x8x4xf32>
    %35 = arith.truncf %34 : vector<8x8x4xf32> to vector<8x8x4xbf16>
    %c0_39 = arith.constant 0 : index
    %c0_40 = arith.constant 0 : index
    %c0_41 = arith.constant 0 : index
    %c12 = arith.constant 12 : index
    %36 = vector.load %arg6[%c0_39, %c0_40, %c0_41, %c12] : memref<2x8x8x36xbf16, #tpu.memory_space<vmem>>, vector<1x8x8x4xbf16>
    %37 = vector.shape_cast %36 : vector<1x8x8x4xbf16> to vector<8x8x4xbf16>
    %38 = vector.shape_cast %35 : vector<8x8x4xbf16> to vector<1x8x8x4xbf16>
    tpu.vector_store %arg6[%c0_39, %c0_40, %c0_41, %c12], %38 {strides = array<i32>} : memref<2x8x8x36xbf16, #tpu.memory_space<vmem>>, vector<1x8x8x4xbf16>,
    %c1_42 = arith.constant 1 : index
    %c8_43 = arith.constant 8 : index
    %c0_44 = arith.constant 0 : index
    %39 = vector.load %arg5[%c1_42, %c8_43, %c0_44] : memref<10x17x4xf32, #tpu.memory_space<vmem>>, vector<8x8x4xf32>
    %40 = arith.truncf %39 : vector<8x8x4xf32> to vector<8x8x4xbf16>
    %c0_45 = arith.constant 0 : index
    %c0_46 = arith.constant 0 : index
    %c0_47 = arith.constant 0 : index
    %c16_48 = arith.constant 16 : index
    %41 = vector.load %arg6[%c0_45, %c0_46, %c0_47, %c16_48] : memref<2x8x8x36xbf16, #tpu.memory_space<vmem>>, vector<1x8x8x4xbf16>
    %42 = vector.shape_cast %41 : vector<1x8x8x4xbf16> to vector<8x8x4xbf16>
    %43 = vector.shape_cast %40 : vector<8x8x4xbf16> to vector<1x8x8x4xbf16>
    tpu.vector_store %arg6[%c0_45, %c0_46, %c0_47, %c16_48], %43 {strides = array<i32>} : memref<2x8x8x36xbf16, #tpu.memory_space<vmem>>, vector<1x8x8x4xbf16>,
    %c1_49 = arith.constant 1 : index
    %c9_50 = arith.constant 9 : index
    %c0_51 = arith.constant 0 : index
    %44 = vector.load %arg5[%c1_49, %c9_50, %c0_51] : memref<10x17x4xf32, #tpu.memory_space<vmem>>, vector<8x8x4xf32>
    %45 = arith.truncf %44 : vector<8x8x4xf32> to vector<8x8x4xbf16>
    %c0_52 = arith.constant 0 : index
    %c0_53 = arith.constant 0 : index
    %c0_54 = arith.constant 0 : index
    %c20 = arith.constant 20 : index
    %46 = vector.load %arg6[%c0_52, %c0_53, %c0_54, %c20] : memref<2x8x8x36xbf16, #tpu.memory_space<vmem>>, vector<1x8x8x4xbf16>
    %47 = vector.shape_cast %46 : vector<1x8x8x4xbf16> to vector<8x8x4xbf16>
    %48 = vector.shape_cast %45 : vector<8x8x4xbf16> to vector<1x8x8x4xbf16>
    tpu.vector_store %arg6[%c0_52, %c0_53, %c0_54, %c20], %48 {strides = array<i32>} : memref<2x8x8x36xbf16, #tpu.memory_space<vmem>>, vector<1x8x8x4xbf16>,
    %c2 = arith.constant 2 : index
    %c7_55 = arith.constant 7 : index
    %c0_56 = arith.constant 0 : index
    %49 = vector.load %arg5[%c2, %c7_55, %c0_56] : memref<10x17x4xf32, #tpu.memory_space<vmem>>, vector<8x8x4xf32>
    %50 = arith.truncf %49 : vector<8x8x4xf32> to vector<8x8x4xbf16>
    %c0_57 = arith.constant 0 : index
    %c0_58 = arith.constant 0 : index
    %c0_59 = arith.constant 0 : index
    %c24 = arith.constant 24 : index
    %51 = vector.load %arg6[%c0_57, %c0_58, %c0_59, %c24] : memref<2x8x8x36xbf16, #tpu.memory_space<vmem>>, vector<1x8x8x4xbf16>
    %52 = vector.shape_cast %51 : vector<1x8x8x4xbf16> to vector<8x8x4xbf16>
    %53 = vector.shape_cast %50 : vector<8x8x4xbf16> to vector<1x8x8x4xbf16>
    tpu.vector_store %arg6[%c0_57, %c0_58, %c0_59, %c24], %53 {strides = array<i32>} : memref<2x8x8x36xbf16, #tpu.memory_space<vmem>>, vector<1x8x8x4xbf16>,
    %c2_60 = arith.constant 2 : index
    %c8_61 = arith.constant 8 : index
    %c0_62 = arith.constant 0 : index
    %54 = vector.load %arg5[%c2_60, %c8_61, %c0_62] : memref<10x17x4xf32, #tpu.memory_space<vmem>>, vector<8x8x4xf32>
    %55 = arith.truncf %54 : vector<8x8x4xf32> to vector<8x8x4xbf16>
    %c0_63 = arith.constant 0 : index
    %c0_64 = arith.constant 0 : index
    %c0_65 = arith.constant 0 : index
    %c28 = arith.constant 28 : index
    %56 = vector.load %arg6[%c0_63, %c0_64, %c0_65, %c28] : memref<2x8x8x36xbf16, #tpu.memory_space<vmem>>, vector<1x8x8x4xbf16>
    %57 = vector.shape_cast %56 : vector<1x8x8x4xbf16> to vector<8x8x4xbf16>
    %58 = vector.shape_cast %55 : vector<8x8x4xbf16> to vector<1x8x8x4xbf16>
    tpu.vector_store %arg6[%c0_63, %c0_64, %c0_65, %c28], %58 {strides = array<i32>} : memref<2x8x8x36xbf16, #tpu.memory_space<vmem>>, vector<1x8x8x4xbf16>,
    %c2_66 = arith.constant 2 : index
    %c9_67 = arith.constant 9 : index
    %c0_68 = arith.constant 0 : index
    %59 = vector.load %arg5[%c2_66, %c9_67, %c0_68] : memref<10x17x4xf32, #tpu.memory_space<vmem>>, vector<8x8x4xf32>
    %60 = arith.truncf %59 : vector<8x8x4xf32> to vector<8x8x4xbf16>
    %c0_69 = arith.constant 0 : index
    %c0_70 = arith.constant 0 : index
    %c0_71 = arith.constant 0 : index
    %c32 = arith.constant 32 : index
    %61 = vector.load %arg6[%c0_69, %c0_70, %c0_71, %c32] : memref<2x8x8x36xbf16, #tpu.memory_space<vmem>>, vector<1x8x8x4xbf16>
    %62 = vector.shape_cast %61 : vector<1x8x8x4xbf16> to vector<8x8x4xbf16>
    %63 = vector.shape_cast %60 : vector<8x8x4xbf16> to vector<1x8x8x4xbf16>
    tpu.vector_store %arg6[%c0_69, %c0_70, %c0_71, %c32], %63 {strides = array<i32>} : memref<2x8x8x36xbf16, #tpu.memory_space<vmem>>, vector<1x8x8x4xbf16>,
    %c1_72 = arith.constant 1 : index
    %c0_73 = arith.constant 0 : index
    %c0_74 = arith.constant 0 : index
    %c0_75 = arith.constant 0 : index
    %c0_76 = arith.constant 0 : index
    %64 = vector.load %arg1[%c1_72, %c0_73, %c0_74, %c0_75, %c0_76] : memref<2x8x2x8x8xf32, #tpu.memory_space<vmem>>, vector<1x8x2x8x8xf32>
    %65 = vector.shape_cast %64 : vector<1x8x2x8x8xf32> to vector<8x2x8x8xf32>
    %66 = vector.extract_strided_slice %65 {offsets = [0, 0, 0, 0], sizes = [8, 1, 8, 8], strides = [1, 1, 1, 1]} : vector<8x2x8x8xf32> to vector<8x1x8x8xf32>
    %67 = vector.shape_cast %66 : vector<8x1x8x8xf32> to vector<8x8x8xf32>
    %68 = vector.extract_strided_slice %65 {offsets = [0, 1, 0, 0], sizes = [8, 1, 8, 8], strides = [1, 1, 1, 1]} : vector<8x2x8x8xf32> to vector<8x1x8x8xf32>
    %69 = vector.shape_cast %68 : vector<8x1x8x8xf32> to vector<8x8x8xf32>
    %70 = arith.addf %67, %69 : vector<8x8x8xf32>
    %71 = vector.extract_strided_slice %70 {offsets = [0, 0, 0], sizes = [8, 8, 4], strides = [1, 1, 1]} : vector<8x8x8xf32> to vector<8x8x4xf32>
    %72 = vector.extract_strided_slice %70 {offsets = [0, 0, 4], sizes = [8, 8, 4], strides = [1, 1, 1]} : vector<8x8x8xf32> to vector<8x8x4xf32>
    %73 = arith.addf %71, %72 : vector<8x8x4xf32>
    %cst_77 = arith.constant 2.500000e-01 : f32
    %74 = vector.broadcast %cst_77 : f32 to vector<8x8x4xf32>
    %75 = arith.mulf %73, %74 : vector<8x8x4xf32>
    %c1_78 = arith.constant 1 : index
    %c8_79 = arith.constant 8 : index
    %c0_80 = arith.constant 0 : index
    %76 = vector.load %arg5[%c1_78, %c8_79, %c0_80] : memref<10x17x4xf32, #tpu.memory_space<vmem>>, vector<8x8x4xf32>
    tpu.vector_store %arg5[%c1_78, %c8_79, %c0_80], %75 {strides = array<i32>} : memref<10x17x4xf32, #tpu.memory_space<vmem>>, vector<8x8x4xf32>,
    %c0_81 = arith.constant 0 : index
    %c7_82 = arith.constant 7 : index
    %c0_83 = arith.constant 0 : index
    %77 = vector.load %arg5[%c0_81, %c7_82, %c0_83] : memref<10x17x4xf32, #tpu.memory_space<vmem>>, vector<8x8x4xf32>
    %78 = arith.truncf %77 : vector<8x8x4xf32> to vector<8x8x4xbf16>
    %c1_84 = arith.constant 1 : index
    %c0_85 = arith.constant 0 : index
    %c0_86 = arith.constant 0 : index
    %c0_87 = arith.constant 0 : index
    %79 = vector.load %arg6[%c1_84, %c0_85, %c0_86, %c0_87] : memref<2x8x8x36xbf16, #tpu.memory_space<vmem>>, vector<1x8x8x4xbf16>
    %80 = vector.shape_cast %79 : vector<1x8x8x4xbf16> to vector<8x8x4xbf16>
    %81 = vector.shape_cast %78 : vector<8x8x4xbf16> to vector<1x8x8x4xbf16>
    tpu.vector_store %arg6[%c1_84, %c0_85, %c0_86, %c0_87], %81 {strides = array<i32>} : memref<2x8x8x36xbf16, #tpu.memory_space<vmem>>, vector<1x8x8x4xbf16>,
    %c0_88 = arith.constant 0 : index
    %c8_89 = arith.constant 8 : index
    %c0_90 = arith.constant 0 : index
    %82 = vector.load %arg5[%c0_88, %c8_89, %c0_90] : memref<10x17x4xf32, #tpu.memory_space<vmem>>, vector<8x8x4xf32>
    %83 = arith.truncf %82 : vector<8x8x4xf32> to vector<8x8x4xbf16>
    %c1_91 = arith.constant 1 : index
    %c0_92 = arith.constant 0 : index
    %c0_93 = arith.constant 0 : index
    %c4_94 = arith.constant 4 : index
    %84 = vector.load %arg6[%c1_91, %c0_92, %c0_93, %c4_94] : memref<2x8x8x36xbf16, #tpu.memory_space<vmem>>, vector<1x8x8x4xbf16>
    %85 = vector.shape_cast %84 : vector<1x8x8x4xbf16> to vector<8x8x4xbf16>
    %86 = vector.shape_cast %83 : vector<8x8x4xbf16> to vector<1x8x8x4xbf16>
    tpu.vector_store %arg6[%c1_91, %c0_92, %c0_93, %c4_94], %86 {strides = array<i32>} : memref<2x8x8x36xbf16, #tpu.memory_space<vmem>>, vector<1x8x8x4xbf16>,
    %c0_95 = arith.constant 0 : index
    %c9_96 = arith.constant 9 : index
    %c0_97 = arith.constant 0 : index
    %87 = vector.load %arg5[%c0_95, %c9_96, %c0_97] : memref<10x17x4xf32, #tpu.memory_space<vmem>>, vector<8x8x4xf32>
    %88 = arith.truncf %87 : vector<8x8x4xf32> to vector<8x8x4xbf16>
    %c1_98 = arith.constant 1 : index
    %c0_99 = arith.constant 0 : index
    %c0_100 = arith.constant 0 : index
    %c8_101 = arith.constant 8 : index
    %89 = vector.load %arg6[%c1_98, %c0_99, %c0_100, %c8_101] : memref<2x8x8x36xbf16, #tpu.memory_space<vmem>>, vector<1x8x8x4xbf16>
    %90 = vector.shape_cast %89 : vector<1x8x8x4xbf16> to vector<8x8x4xbf16>
    %91 = vector.shape_cast %88 : vector<8x8x4xbf16> to vector<1x8x8x4xbf16>
    tpu.vector_store %arg6[%c1_98, %c0_99, %c0_100, %c8_101], %91 {strides = array<i32>} : memref<2x8x8x36xbf16, #tpu.memory_space<vmem>>, vector<1x8x8x4xbf16>,
    %c1_102 = arith.constant 1 : index
    %c7_103 = arith.constant 7 : index
    %c0_104 = arith.constant 0 : index
    %92 = vector.load %arg5[%c1_102, %c7_103, %c0_104] : memref<10x17x4xf32, #tpu.memory_space<vmem>>, vector<8x8x4xf32>
    %93 = arith.truncf %92 : vector<8x8x4xf32> to vector<8x8x4xbf16>
    %c1_105 = arith.constant 1 : index
    %c0_106 = arith.constant 0 : index
    %c0_107 = arith.constant 0 : index
    %c12_108 = arith.constant 12 : index
    %94 = vector.load %arg6[%c1_105, %c0_106, %c0_107, %c12_108] : memref<2x8x8x36xbf16, #tpu.memory_space<vmem>>, vector<1x8x8x4xbf16>
    %95 = vector.shape_cast %94 : vector<1x8x8x4xbf16> to vector<8x8x4xbf16>
    %96 = vector.shape_cast %93 : vector<8x8x4xbf16> to vector<1x8x8x4xbf16>
    tpu.vector_store %arg6[%c1_105, %c0_106, %c0_107, %c12_108], %96 {strides = array<i32>} : memref<2x8x8x36xbf16, #tpu.memory_space<vmem>>, vector<1x8x8x4xbf16>,
    %c1_109 = arith.constant 1 : index
    %c8_110 = arith.constant 8 : index
    %c0_111 = arith.constant 0 : index
    %97 = vector.load %arg5[%c1_109, %c8_110, %c0_111] : memref<10x17x4xf32, #tpu.memory_space<vmem>>, vector<8x8x4xf32>
    %98 = arith.truncf %97 : vector<8x8x4xf32> to vector<8x8x4xbf16>
    %c1_112 = arith.constant 1 : index
    %c0_113 = arith.constant 0 : index
    %c0_114 = arith.constant 0 : index
    %c16_115 = arith.constant 16 : index
    %99 = vector.load %arg6[%c1_112, %c0_113, %c0_114, %c16_115] : memref<2x8x8x36xbf16, #tpu.memory_space<vmem>>, vector<1x8x8x4xbf16>
    %100 = vector.shape_cast %99 : vector<1x8x8x4xbf16> to vector<8x8x4xbf16>
    %101 = vector.shape_cast %98 : vector<8x8x4xbf16> to vector<1x8x8x4xbf16>
    tpu.vector_store %arg6[%c1_112, %c0_113, %c0_114, %c16_115], %101 {strides = array<i32>} : memref<2x8x8x36xbf16, #tpu.memory_space<vmem>>, vector<1x8x8x4xbf16>,
    %c1_116 = arith.constant 1 : index
    %c9_117 = arith.constant 9 : index
    %c0_118 = arith.constant 0 : index
    %102 = vector.load %arg5[%c1_116, %c9_117, %c0_118] : memref<10x17x4xf32, #tpu.memory_space<vmem>>, vector<8x8x4xf32>
    %103 = arith.truncf %102 : vector<8x8x4xf32> to vector<8x8x4xbf16>
    %c1_119 = arith.constant 1 : index
    %c0_120 = arith.constant 0 : index
    %c0_121 = arith.constant 0 : index
    %c20_122 = arith.constant 20 : index
    %104 = vector.load %arg6[%c1_119, %c0_120, %c0_121, %c20_122] : memref<2x8x8x36xbf16, #tpu.memory_space<vmem>>, vector<1x8x8x4xbf16>
    %105 = vector.shape_cast %104 : vector<1x8x8x4xbf16> to vector<8x8x4xbf16>
    %106 = vector.shape_cast %103 : vector<8x8x4xbf16> to vector<1x8x8x4xbf16>
    tpu.vector_store %arg6[%c1_119, %c0_120, %c0_121, %c20_122], %106 {strides = array<i32>} : memref<2x8x8x36xbf16, #tpu.memory_space<vmem>>, vector<1x8x8x4xbf16>,
    %c2_123 = arith.constant 2 : index
    %c7_124 = arith.constant 7 : index
    %c0_125 = arith.constant 0 : index
    %107 = vector.load %arg5[%c2_123, %c7_124, %c0_125] : memref<10x17x4xf32, #tpu.memory_space<vmem>>, vector<8x8x4xf32>
    %108 = arith.truncf %107 : vector<8x8x4xf32> to vector<8x8x4xbf16>
    %c1_126 = arith.constant 1 : index
    %c0_127 = arith.constant 0 : index
    %c0_128 = arith.constant 0 : index
    %c24_129 = arith.constant 24 : index
    %109 = vector.load %arg6[%c1_126, %c0_127, %c0_128, %c24_129] : memref<2x8x8x36xbf16, #tpu.memory_space<vmem>>, vector<1x8x8x4xbf16>
    %110 = vector.shape_cast %109 : vector<1x8x8x4xbf16> to vector<8x8x4xbf16>
    %111 = vector.shape_cast %108 : vector<8x8x4xbf16> to vector<1x8x8x4xbf16>
    tpu.vector_store %arg6[%c1_126, %c0_127, %c0_128, %c24_129], %111 {strides = array<i32>} : memref<2x8x8x36xbf16, #tpu.memory_space<vmem>>, vector<1x8x8x4xbf16>,
    %c2_130 = arith.constant 2 : index
    %c8_131 = arith.constant 8 : index
    %c0_132 = arith.constant 0 : index
    %112 = vector.load %arg5[%c2_130, %c8_131, %c0_132] : memref<10x17x4xf32, #tpu.memory_space<vmem>>, vector<8x8x4xf32>
    %113 = arith.truncf %112 : vector<8x8x4xf32> to vector<8x8x4xbf16>
    %c1_133 = arith.constant 1 : index
    %c0_134 = arith.constant 0 : index
    %c0_135 = arith.constant 0 : index
    %c28_136 = arith.constant 28 : index
    %114 = vector.load %arg6[%c1_133, %c0_134, %c0_135, %c28_136] : memref<2x8x8x36xbf16, #tpu.memory_space<vmem>>, vector<1x8x8x4xbf16>
    %115 = vector.shape_cast %114 : vector<1x8x8x4xbf16> to vector<8x8x4xbf16>
    %116 = vector.shape_cast %113 : vector<8x8x4xbf16> to vector<1x8x8x4xbf16>
    tpu.vector_store %arg6[%c1_133, %c0_134, %c0_135, %c28_136], %116 {strides = array<i32>} : memref<2x8x8x36xbf16, #tpu.memory_space<vmem>>, vector<1x8x8x4xbf16>,
    %c2_137 = arith.constant 2 : index
    %c9_138 = arith.constant 9 : index
    %c0_139 = arith.constant 0 : index
    %117 = vector.load %arg5[%c2_137, %c9_138, %c0_139] : memref<10x17x4xf32, #tpu.memory_space<vmem>>, vector<8x8x4xf32>
    %118 = arith.truncf %117 : vector<8x8x4xf32> to vector<8x8x4xbf16>
    %c1_140 = arith.constant 1 : index
    %c0_141 = arith.constant 0 : index
    %c0_142 = arith.constant 0 : index
    %c32_143 = arith.constant 32 : index
    %119 = vector.load %arg6[%c1_140, %c0_141, %c0_142, %c32_143] : memref<2x8x8x36xbf16, #tpu.memory_space<vmem>>, vector<1x8x8x4xbf16>
    %120 = vector.shape_cast %119 : vector<1x8x8x4xbf16> to vector<8x8x4xbf16>
    %121 = vector.shape_cast %118 : vector<8x8x4xbf16> to vector<1x8x8x4xbf16>
    tpu.vector_store %arg6[%c1_140, %c0_141, %c0_142, %c32_143], %121 {strides = array<i32>} : memref<2x8x8x36xbf16, #tpu.memory_space<vmem>>, vector<1x8x8x4xbf16>,
    %c0_144 = arith.constant 0 : index
    %c0_145 = arith.constant 0 : index
    %c0_146 = arith.constant 0 : index
    %c0_147 = arith.constant 0 : index
    %122 = vector.load %arg6[%c0_144, %c0_145, %c0_146, %c0_147] : memref<2x8x8x36xbf16, #tpu.memory_space<vmem>>, vector<2x8x8x36xbf16>
    %123 = vector.shape_cast %122 : vector<2x8x8x36xbf16> to vector<128x36xbf16>
    %c0_148 = arith.constant 0 : index
    %c0_149 = arith.constant 0 : index
    %124 = vector.load %arg2[%c0_148, %c0_149] : memref<8x36xbf16, #tpu.memory_space<vmem>>, vector<8x36xbf16>
    %cst_150 = arith.constant dense<0.000000e+00> : vector<128x8xf32>
    %125 = tpu.matmul %123, %124, %cst_150 {dimension_numbers = #tpu.dot_dimension_numbers<[1], [1], [0], [0], [0, 0, 1, 0], [], []>} : vector<128x36xbf16>, vector<8x36xbf16>, vector<128x8xf32> -> vector<128x8xf32>
    %126 = vector.extract_strided_slice %125 {offsets = [0, 0], sizes = [64, 8], strides = [1, 1]} : vector<128x8xf32> to vector<64x8xf32>
    %127 = tpu.transpose %126, [1, 0] : vector<64x8xf32> -> vector<8x64xf32>
    %c0_151 = arith.constant 0 : index
    %c0_152 = arith.constant 0 : index
    %128 = vector.load %arg3[%c0_151, %c0_152] : memref<8x1xf32, #tpu.memory_space<vmem>>, vector<8x1xf32>
    %129 = vector.broadcast %128 : vector<8x1xf32> to vector<8x64xf32>
    %130 = arith.addf %127, %129 : vector<8x64xf32>
    %c0_153 = arith.constant 0 : index
    %c0_154 = arith.constant 0 : index
    %c0_155 = arith.constant 0 : index
    %131 = vector.load %arg4[%c0_153, %c0_154, %c0_155] : memref<2x8x64xf32, #tpu.memory_space<vmem>>, vector<1x8x64xf32>
    %132 = vector.shape_cast %131 : vector<1x8x64xf32> to vector<8x64xf32>
    %133 = vector.shape_cast %130 : vector<8x64xf32> to vector<1x8x64xf32>
    tpu.vector_store %arg4[%c0_153, %c0_154, %c0_155], %133 {strides = array<i32>} : memref<2x8x64xf32, #tpu.memory_space<vmem>>, vector<1x8x64xf32>,
    %134 = vector.extract_strided_slice %125 {offsets = [64, 0], sizes = [64, 8], strides = [1, 1]} : vector<128x8xf32> to vector<64x8xf32>
    %135 = tpu.transpose %134, [1, 0] : vector<64x8xf32> -> vector<8x64xf32>
    %c0_156 = arith.constant 0 : index
    %c0_157 = arith.constant 0 : index
    %136 = vector.load %arg3[%c0_156, %c0_157] : memref<8x1xf32, #tpu.memory_space<vmem>>, vector<8x1xf32>
    %137 = vector.broadcast %136 : vector<8x1xf32> to vector<8x64xf32>
    %138 = arith.addf %135, %137 : vector<8x64xf32>
    %c1_158 = arith.constant 1 : index
    %c0_159 = arith.constant 0 : index
    %c0_160 = arith.constant 0 : index
    %139 = vector.load %arg4[%c1_158, %c0_159, %c0_160] : memref<2x8x64xf32, #tpu.memory_space<vmem>>, vector<1x8x64xf32>
    %140 = vector.shape_cast %139 : vector<1x8x64xf32> to vector<8x64xf32>
    %141 = vector.shape_cast %138 : vector<8x64xf32> to vector<1x8x64xf32>
    tpu.vector_store %arg4[%c1_158, %c0_159, %c0_160], %141 {strides = array<i32>} : memref<2x8x64xf32, #tpu.memory_space<vmem>>, vector<1x8x64xf32>,
    return
  }
  func.func @transform_0(%arg0: i32) -> (i32, i32, i32, i32, i32) {
    %c0_i32 = arith.constant 0 : i32
    %c0_i32_0 = arith.constant 0 : i32
    %c0_i32_1 = arith.constant 0 : i32
    %c0_i32_2 = arith.constant 0 : i32
    %c0_i32_3 = arith.constant 0 : i32
    return %arg0, %c0_i32, %c0_i32_0, %c0_i32_1, %c0_i32_2 : i32, i32, i32, i32, i32
  }
  func.func @transform_1(%arg0: i32) -> (i32, i32) {
    %c0_i32 = arith.constant 0 : i32
    %c0_i32_0 = arith.constant 0 : i32
    %c0_i32_1 = arith.constant 0 : i32
    return %c0_i32, %c0_i32_0 : i32, i32
  }
  func.func @transform_2(%arg0: i32) -> (i32, i32) {
    %c0_i32 = arith.constant 0 : i32
    %c0_i32_0 = arith.constant 0 : i32
    %c0_i32_1 = arith.constant 0 : i32
    return %c0_i32, %c0_i32_0 : i32, i32
  }
  func.func @transform_3(%arg0: i32) -> (i32, i32, i32) {
    %c0_i32 = arith.constant 0 : i32
    %c0_i32_0 = arith.constant 0 : i32
    %c0_i32_1 = arith.constant 0 : i32
    return %arg0, %c0_i32, %c0_i32_0 : i32, i32, i32
  }
}

</mosaic_0001>

<bundles_post_ra>
// kernel: tpu_custom_call.1
= control target key start
LH: loop header
LB: loop body
LE: loop exit
PB: predicated region body
PF: predicated region fallthrough
CT: control target
= control target key end

     0   :  { %8 = vsyncpa [#allocation5], 0  ;;  %s2877_s0 = inlined_call_operand.hbm [shape: f32[2,8,2,8,8], index: 0, kind: input, shape index: {}]   ;;  %s2878_s1 = inlined_call_operand.hbm [shape: bf16[8,36], index: 1, kind: input, shape index: {}]   ;;  %s2879_s2 = inlined_call_operand.hbm [shape: f32[8,1], index: 2, kind: input, shape index: {}]   ;;  %s2880_s3 = inlined_call_operand.hbm [shape: f32[2,8,64], index: 3, kind: output, shape index: {}]  }
   0x1   :  { %9 = vsyncpa [#allocation8], 0 }
   0x2   :  { %10 = vsyncpa [#allocation6], 0  ;;  %s2159_s12 = smov [#allocation7]   ;;  %s2160_s14 = smov [#allocation4]  }
   0x3   :  { %s29_s13 = sshll.u32 %s2159_s12, 4  ;;  %s16_s15 = sshll.u32 %s2160_s14, 4  ;;  %s30_s13 = int_to_ptr.vmem [resolvable:$true] %s29_s13  ;;  %s2195_s15 = int_to_ptr.vmem [resolvable:$true] %s16_s15 }
   0x4   :  { %s2065_s18 = scalar_lea.hbm %s2878_s1, 64 }
   0x5   :  { %p2066_p0 = scmp.ne.s32.totalorder %s2878_s1, %s2065_s18  ;;  %p2069_p1 = scmp.lt.u32.totalorder %s2065_s18, %s2878_s1 }
   0x7   :  { %p2071_p2 = pnand %p2069_p1, %p2066_p0 }
   0x9   :  { %2074 = shalt.err (!%p2071_p2)
}
   0xa   :  { %s2075_s23 = scalar_lea.vmem %s30_s13, 64  ;;  %p2080_p4 = scmp.lt.s32.totalorder %s30_s13, %s30_s13 }
   0xb   :  { %p2076_p3 = scmp.ne.s32.totalorder %s30_s13, %s2075_s23  ;;  %p2081_p5 = scmp.lt.s32.totalorder %s2075_s23, %s2075_s23 }
   0xd   :  { %p2082_p6 = por %p2081_p5, %p2080_p4 }
   0xf   :  { %p2083_p7 = pnand %p2082_p6, %p2076_p3 }
  0x11   :  { %2086 = shalt.err (!%p2083_p7)
}
  0x12   :  { %32 = dma.hbm_to_vmem [thread:$0]  %s2878_s1, 64, %s30_s13, [#allocation8]  }
  0x13   :  { %s2087_s28 = scalar_lea.hbm %s2877_s0, 4096 }
  0x14   :  { %p2088_p8 = scmp.ne.s32.totalorder %s2877_s0, %s2087_s28  ;;  %p2091_p9 = scmp.lt.u32.totalorder %s2087_s28, %s2877_s0 }
  0x16   :  { %p2093_p10 = pnand %p2091_p9, %p2088_p8 }
  0x18   :  { %2096 = shalt.err (!%p2093_p10)
}
  0x19   :  { %s2097_s6 = scalar_lea.vmem %s2195_s15, 4096  ;;  %p2102_p12 = scmp.lt.s32.totalorder %s2195_s15, %s2195_s15 }
  0x1a   :  { %p2098_p11 = scmp.ne.s32.totalorder %s2195_s15, %s2097_s6  ;;  %p2103_p13 = scmp.lt.s32.totalorder %s2097_s6, %s2097_s6 }
  0x1c   :  { %p2104_p0 = por %p2103_p13, %p2102_p12 }
  0x1e   :  { %p2105_p1 = pnand %p2104_p0, %p2098_p11 }
  0x20   :  { %2108 = shalt.err (!%p2105_p1)
}
  0x21   :  { %s2161_s1 = smov 128   ;;  %s2162_s7 = smov 8  }
  0x22   :  { %22 = dma.hbm_to_vmem [thread:$0]  %s2877_s0, 4096, %s2195_s15, [#allocation5], %s2161_s1, %s2161_s1, %s2162_s7  }
  0x23   :  { %s2163_s10 = smov [#allocation9]   ;;  %s2109_s14 = scalar_lea.hbm %s2879_s2, 128 }
  0x24   :  { %s39_s11 = sshll.u32 %s2163_s10, 4  ;;  %p2110_p2 = scmp.ne.s32.totalorder %s2879_s2, %s2109_s14  ;;  %s40_s11 = int_to_ptr.vmem [resolvable:$true] %s39_s11 }
  0x25   :  { %p2113_p3 = scmp.lt.u32.totalorder %s2109_s14, %s2879_s2 }
  0x27   :  { %p2115_p4 = pnand %p2113_p3, %p2110_p2 }
  0x29   :  { %2118 = shalt.err (!%p2115_p4)
}
  0x2a   :  { %s2119_s20 = scalar_lea.vmem %s40_s11, 128  ;;  %p2124_p6 = scmp.lt.s32.totalorder %s40_s11, %s40_s11 }
  0x2b   :  { %p2120_p5 = scmp.ne.s32.totalorder %s40_s11, %s2119_s20  ;;  %p2125_p7 = scmp.lt.s32.totalorder %s2119_s20, %s2119_s20 }
  0x2d   :  { %p2126_p8 = por %p2125_p7, %p2124_p6 }
  0x2f   :  { %p2127_p9 = pnand %p2126_p8, %p2120_p5 }
  0x31   :  { %2130 = shalt.err (!%p2127_p9)
}
  0x32   :  { %42 = dma.hbm_to_vmem [thread:$0]  %s2879_s2, 128, %s40_s11, [#allocation8]  }
  0x33   :  { %2153 = dma.done.wait [#allocation5], 4096  }
  0x34   :  { %2154 = vsyncadd [#allocation5], 4294963200 }
  0x35   :  { %2155 = dma.done.wait [#allocation8], 192  }
  0x36   :  { %2156 = vsyncadd [#allocation8], 4294967104  ;;  %vm53_vm0 = vcmask 31744   ;;  %vm55_vm1 = vcmask 25600   ;;  %v2164_v0 = vmov 0.0   ;;  %vm60_vm2 = vcmask 24576  }
  0x37   :  { %54 = vst.msk [vmem:[#allocation2 + $0x7] sm:$0xff] %vm53_vm0, %v2164_v0  ;;  %58 = vst.msk [vmem:[#allocation2 + $0xdf] sm:$0xff] %vm53_vm0, %v2164_v0  ;;  %v85_v1 = vld [vmem:[#allocation4 + $0x20] sm:$0xff]  ;;  %v86_v2 = vld [vmem:[#allocation4 + $0x28] sm:$0xff]  ;;  %s2165_s2 = smov 124   ;;  %s2166_s21 = smov 4  }
  0x38   :  { %56 = vst.msk [vmem:[#allocation2 + $0xf] sm:$0x3] %vm55_vm1, %v2164_v0  ;;  %59 = vst.msk [vmem:[#allocation2 + $0xe7] sm:$0x3] %vm55_vm1, %v2164_v0  ;;  %v81_v3 = vld [vmem:[#allocation4] sm:$0xff]  ;;  %v2263_v4 = vadd.f32 %v86_v2, %v85_v1  ;;  %v82_v5 = vld [vmem:[#allocation4 + $0x8] sm:$0xff] }
  0x39   :  { %76 = vst.msk [vmem:[#allocation2 + $0x88] sm:$0x1] %vm60_vm2, %v2164_v0  ;;  %61 = vst.msk [vmem:[#allocation2 + $0x7] sm:$0x1] %vm60_vm2, %v2164_v0  ;;  %v87_v6 = vld [vmem:[#allocation4 + $0x30] sm:$0xff]  ;;  %v88_v7 = vld [vmem:[#allocation4 + $0x38] sm:$0xff]  ;;  %v2265_v8 = vadd.f32 %v82_v5, %v81_v3 }
  0x3a   :  { %62 = vst.msk [vmem:[#allocation2 + $0x1f] sm:$0x1] %vm60_vm2, %v2164_v0  ;;  %63 = vst.msk [vmem:[#allocation2 + $0x37] sm:$0x1] %vm60_vm2, %v2164_v0  ;;  %v83_v9 = vld [vmem:[#allocation4 + $0x10] sm:$0xff]  ;;  %v84_v10 = vld [vmem:[#allocation4 + $0x18] sm:$0xff]  ;;  %117 = vrot.lane.b32.xlu1 %v2263_v4, %s2165_s2  ;;  %v2269_v11 = vadd.f32 %v88_v7, %v87_v6 }
  0x3b   :  { %64 = vst.msk [vmem:[#allocation2 + $0x4f] sm:$0x1] %vm60_vm2, %v2164_v0  ;;  %65 = vst.msk [vmem:[#allocation2 + $0x67] sm:$0x1] %vm60_vm2, %v2164_v0  ;;  %113 = vrot.lane.b32.xlu0 %v2265_v8, %s2165_s2  ;;  %v2273_v12 = vadd.f32 %v84_v10, %v83_v9  ;;  %v773_v13 = vld [vmem:[#allocation4 + $0x80] sm:$0xff]  ;;  %v774_v14 = vld [vmem:[#allocation4 + $0x88] sm:$0xff] }
  0x3c   :  { %66 = vst.msk [vmem:[#allocation2 + $0x7f] sm:$0x1] %vm60_vm2, %v2164_v0  ;;  %67 = vst.msk [vmem:[#allocation2 + $0x97] sm:$0x1] %vm60_vm2, %v2164_v0  ;;  %v89_v15 = vld [vmem:[#allocation4 + $0x40] sm:$0xff]  ;;  %v90_v16 = vld [vmem:[#allocation4 + $0x48] sm:$0xff]  ;;  %v2277_v17 = vadd.f32 %v774_v14, %v773_v13 }
  0x3d   :  { %68 = vst.msk [vmem:[#allocation2 + $0xaf] sm:$0x1] %vm60_vm2, %v2164_v0  ;;  %69 = vst.msk [vmem:[#allocation2 + $0xc7] sm:$0x1] %vm60_vm2, %v2164_v0  ;;  %v2281_v18 = vadd.f32 %v90_v16, %v89_v15  ;;  %v93_v19 = vld [vmem:[#allocation4 + $0x60] sm:$0xff]  ;;  %v94_v20 = vld [vmem:[#allocation4 + $0x68] sm:$0xff] }
  0x3e   :  { %70 = vst.msk [vmem:[#allocation2 + $0xdf] sm:$0x1] %vm60_vm2, %v2164_v0  ;;  %71 = vst.msk [vmem:[#allocation2 + $0x10] sm:$0x1] %vm60_vm2, %v2164_v0  ;;  %119 = vrot.lane.b32.xlu1 %v2269_v11, %s2165_s2  ;;  %v91_v21 = vld [vmem:[#allocation4 + $0x50] sm:$0xff]  ;;  %v92_v22 = vld [vmem:[#allocation4 + $0x58] sm:$0xff]  ;;  %v2285_v23 = vadd.f32 %v94_v20, %v93_v19 }
  0x3f   :  { %72 = vst.msk [vmem:[#allocation2 + $0x28] sm:$0x1] %vm60_vm2, %v2164_v0  ;;  %73 = vst.msk [vmem:[#allocation2 + $0x40] sm:$0x1] %vm60_vm2, %v2164_v0  ;;  %115 = vrot.lane.b32.xlu0 %v2273_v12, %s2165_s2  ;;  %v2289_v24 = vadd.f32 %v92_v22, %v91_v21  ;;  %v777_v25 = vld [vmem:[#allocation4 + $0xa0] sm:$0xff]  ;;  %v778_v26 = vld [vmem:[#allocation4 + $0xa8] sm:$0xff] }
  0x40   :  { %74 = vst.msk [vmem:[#allocation2 + $0x58] sm:$0x1] %vm60_vm2, %v2164_v0  ;;  %75 = vst.msk [vmem:[#allocation2 + $0x70] sm:$0x1] %vm60_vm2, %v2164_v0  ;;  %v775_v27 = vld [vmem:[#allocation4 + $0x90] sm:$0xff]  ;;  %v776_v28 = vld [vmem:[#allocation4 + $0x98] sm:$0xff]  ;;  %v2293_v29 = vadd.f32 %v778_v26, %v777_v25 }
  0x41   :  { %77 = vst.msk [vmem:[#allocation2 + $0xa0] sm:$0x1] %vm60_vm2, %v2164_v0  ;;  %78 = vst.msk [vmem:[#allocation2 + $0xb8] sm:$0x1] %vm60_vm2, %v2164_v0  ;;  %v2297_v30 = vadd.f32 %v776_v28, %v775_v27  ;;  %v779_v31 = vld [vmem:[#allocation4 + $0xb0] sm:$0xff]  ;;  %v780_v32 = vld [vmem:[#allocation4 + $0xb8] sm:$0xff] }
  0x42   :  { %79 = vst.msk [vmem:[#allocation2 + $0xd0] sm:$0x1] %vm60_vm2, %v2164_v0  ;;  %80 = vst.msk [vmem:[#allocation2 + $0xe8] sm:$0x1] %vm60_vm2, %v2164_v0  ;;  %805 = vrot.lane.b32.xlu1 %v2277_v17, %s2165_s2  ;;  %v95_v33 = vld [vmem:[#allocation4 + $0x70] sm:$0xff]  ;;  %v96_v34 = vld [vmem:[#allocation4 + $0x78] sm:$0xff]  ;;  %v2301_v35 = vadd.f32 %v780_v32, %v779_v31 }
  0x43   :  { %121 = vrot.lane.b32.xlu0 %v2281_v18, %s2165_s2  ;;  %v2305_v36 = vadd.f32 %v96_v34, %v95_v33  ;;  %v783_v37 = vld [vmem:[#allocation4 + $0xd0] sm:$0xff]  ;;  %v784_v38 = vld [vmem:[#allocation4 + $0xd8] sm:$0xff]  ;;  %v781_v39 = vld [vmem:[#allocation4 + $0xc0] sm:$0xff]  ;;  %vm178_vm3 = vcmask 27648   ;;  %vm251_vm4 = vcmask 60448   ;;  %s2167_s22 = smov 12  }
  0x44   :  { %v782_v40 = vld [vmem:[#allocation4 + $0xc8] sm:$0xff]  ;;  %v2309_v41 = vadd.f32 %v784_v38, %v783_v37  ;;  %v787_v43 = vld [vmem:[#allocation4 + $0xf0] sm:$0xff]  ;;  %v788_v44 = vld [vmem:[#allocation4 + $0xf8] sm:$0xff]  ;;  %vm324_vm5 = vcmask 93248   ;;  %s2168_s23 = smov 16   ;;  %s2169_s24 = smov 20  }
  0x45   :  { %v2313_v42 = vadd.f32 %v782_v40, %v781_v39  ;;  %v785_v45 = vld [vmem:[#allocation4 + $0xe0] sm:$0xff]  ;;  %v786_v46 = vld [vmem:[#allocation4 + $0xe8] sm:$0xff]  ;;  %v2317_v47 = vadd.f32 %v788_v44, %v787_v43  ;;  %v187_v49 = vld [vmem:[#allocation2 + $0x8] sm:$0xff]  ;;  %s2170_s25 = smov 24   ;;  %s2171_s26 = smov 28   ;;  %vm1511_vm6 = vcmask 293888  }
  0x46   :  { %125 = vrot.lane.b32.xlu1 %v2285_v23, %s2165_s2  ;;  %v2321_v48 = vadd.f32 %v786_v46, %v785_v45  ;;  %v1880_v50 = vpack.c.bf16 %v187_v49, %v187_v49  ;;  %v260_v51 = vld [vmem:[#allocation2 + $0x9] sm:$0xff]  ;;  %s2172_s27 = smov 32   ;;  %vm397_vm7 = vcmask 126048   ;;  %vm470_vm8 = vcmask 158848   ;;  %s2174_s28 = smov [#allocation10]  }
  0x47   :  { %123 = vrot.lane.b32.xlu0 %v2289_v24, %s2165_s2  ;;  %v1888_v52 = vpack.c.bf16 %v260_v51, %v260_v51  ;;  %v162_v53 = vld [vmem:[#allocation2 + $0x7] sm:$0xff]  ;;  %vm543_vm9 = vcmask 191648   ;;  %vm617_vm10 = vcmask 224448   ;;  %vm690_vm11 = vcmask 257248   ;;  %s1723_s29 = sshll.u32 %s2174_s28, 4  ;;  %s1724_s29 = int_to_ptr.vmem [resolvable:$true] %s1723_s29 }
  0x48   :  { %v170_v54 = vpack.c.bf16 %v162_v53, %v162_v53  ;;  %vm763_vm12 = vcmask 290048   ;;  %vm1675_vm13 = vcmask 523264   ;;  %s2131_s30 = scalar_lea.vmem %s1724_s29, 256  ;;  %p2136_p11 = scmp.lt.s32.totalorder %s1724_s29, %s1724_s29 }
  0x49   :  { %p2132_p10 = scmp.ne.s32.totalorder %s1724_s29, %s2131_s30  ;;  %p2137_p12 = scmp.lt.s32.totalorder %s2131_s30, %s2131_s30 }
  0x4a   :  { %809 = vrot.lane.b32.xlu1 %v2293_v29, %s2165_s2  ;;  %179 = vst.msk [vmem:[#allocation3] sm:$0xf] %vm178_vm3, %v170_v54  ;;  %870 = vst.msk [vmem:[#allocation3 + $0x20] sm:$0xf] %vm178_vm3, %v170_v54 }
  0x4b   :  { %807 = vrot.lane.b32.xlu0 %v2297_v30, %s2165_s2  ;;  %p2138_p13 = por %p2137_p12, %p2136_p11 }
  0x4d   :  { %p2139_p0 = pnand %p2138_p13, %p2132_p10 }
  0x4e   :  { %811 = vrot.lane.b32.xlu1 %v2301_v35, %s2165_s2 }
  0x4f   :  { %127 = vrot.lane.b32.xlu0 %v2305_v36, %s2165_s2 }
  0x52   :  { %815 = vrot.lane.b32.xlu1 %v2309_v41, %s2165_s2 }
  0x53   :  { %813 = vrot.lane.b32.xlu0 %v2313_v42, %s2165_s2 }
  0x56   :  { %819 = vrot.lane.b32.xlu1 %v2317_v47, %s2165_s2 }
  0x57   :  { %817 = vrot.lane.b32.xlu0 %v2321_v48, %s2165_s2 }
  0x5b   :  { %227 = vrot.lane.b32.xlu0 %v1880_v50, %s2166_s21 }
  0x5f   :  { %918 = vrot.lane.b32.xlu0 %v1880_v50, %s2166_s21 }
  0x63   :  { %300 = vrot.lane.b32.xlu0 %v1888_v52, %s2162_s7 }
  0x67   :  { %990 = vrot.lane.b32.xlu0 %v1888_v52, %s2162_s7 }
  0xac   :  { %v118_v55 = vpop.permute.xlu1 %117 }
  0xad   :  { %v139_v56 = vadd.f32 %v118_v55, %v2263_v4  ;;  %v114_v57 = vpop.permute.xlu0 %113 }
  0xae   :  { %v137_v58 = vadd.f32 %v114_v57, %v2265_v8 }
  0xaf   :  { %v147_v59 = vmul.f32 0.25, %v139_v56 }
  0xb0   :  { %v145_v60 = vmul.f32 0.25, %v137_v58  ;;  %v120_v61 = vpop.permute.xlu1 %119 }
  0xb1   :  { %156 = vst.msk [vmem:[#allocation2 + $0x50] sm:$0xff] %vm53_vm0, %v147_v59  ;;  %v140_v62 = vadd.f32 %v120_v61, %v2269_v11  ;;  %v116_v63 = vpop.permute.xlu0 %115 }
  0xb2   :  { %154 = vst.msk [vmem:[#allocation2 + $0x20] sm:$0xff] %vm53_vm0, %v145_v60  ;;  %v138_v0 = vadd.f32 %v116_v63, %v2273_v12 }
  0xb3   :  { %v148_v1 = vmul.f32 0.25, %v140_v62 }
  0xb4   :  { %v146_v2 = vmul.f32 0.25, %v138_v0  ;;  %v806_v3 = vpop.permute.xlu1 %805 }
  0xb5   :  { %157 = vst.msk [vmem:[#allocation2 + $0x68] sm:$0xff] %vm53_vm0, %v148_v1  ;;  %v829_v4 = vadd.f32 %v806_v3, %v2277_v17  ;;  %v122_v5 = vpop.permute.xlu0 %121 }
  0xb6   :  { %155 = vst.msk [vmem:[#allocation2 + $0x38] sm:$0xff] %vm53_vm0, %v146_v2  ;;  %v141_v6 = vadd.f32 %v122_v5, %v2281_v18 }
  0xb7   :  { %v837_v7 = vmul.f32 0.25, %v829_v4 }
  0xb8   :  { %v149_v8 = vmul.f32 0.25, %v141_v6  ;;  %v126_v9 = vpop.permute.xlu1 %125  ;;  %v165_v10 = vld [vmem:[#allocation2 + $0x4f] sm:$0xff] }
  0xb9   :  { %v143_v11 = vadd.f32 %v126_v9, %v2285_v23  ;;  %v124_v13 = vpop.permute.xlu0 %123  ;;  %v188_v12 = vld [vmem:[#allocation2 + $0x20] sm:$0xff]  ;;  %v2346_v16 = vpack.c.bf16 %v165_v10, %v165_v10  ;;  %v190_v21 = vld [vmem:[#allocation2 + $0x50] sm:$0xff] }
  0xba   :  { %v2344_v14 = vld [vmem:[#allocation2 + $0x21] sm:$0xff]  ;;  %158 = vst.msk [vmem:[#allocation2 + $0x80] sm:$0xff] %vm53_vm0, %v149_v8  ;;  %v142_v17 = vadd.f32 %v124_v13, %v2289_v24  ;;  %v2350_v19 = vpack.c.bf16 %v188_v12, %v188_v12  ;;  %v2366_v32 = vpack.c.bf16 %v190_v21, %v190_v21 }
  0xbb   :  { %v333_v15 = vld [vmem:[#allocation2 + $0x1f] sm:$0xff]  ;;  %v151_v20 = vmul.f32 0.25, %v143_v11  ;;  %182 = vst.msk [vmem:[#allocation3 + $0xc] sm:$0xf] %vm178_vm3, %v2346_v16  ;;  %v1889_v12 = vpack.c.bf16 %v2344_v14, %v2344_v14 }
  0xbc   :  { %v2352_v18 = vpack.c.bf16 %v333_v15, %v333_v15  ;;  %845 = vst.msk [vmem:[#allocation2 + $0x20] sm:$0xff] %vm53_vm0, %v837_v7  ;;  %v150_v22 = vmul.f32 0.25, %v142_v17  ;;  %229 = vrot.lane.b32.xlu1 %v2350_v19, %s2166_s21  ;;  %v166_v23 = vld [vmem:[#allocation2 + $0x67] sm:$0xff]  ;;  %v810_v25 = vpop.permute.xlu1 %809 }
  0xbd   :  { %160 = vst.msk [vmem:[#allocation2 + $0xb0] sm:$0xff] %vm53_vm0, %v151_v20  ;;  %v189_v24 = vld [vmem:[#allocation2 + $0x38] sm:$0xff]  ;;  %v2362_v27 = vpack.c.bf16 %v166_v23, %v166_v23  ;;  %v808_v28 = vpop.permute.xlu0 %807  ;;  %v831_v31 = vadd.f32 %v810_v25, %v2293_v29  ;;  %v191_v38 = vld [vmem:[#allocation2 + $0x68] sm:$0xff] }
  0xbe   :  { %180 = vst.msk [vmem:[#allocation3 + $0x4] sm:$0xf] %vm178_vm3, %v2352_v18  ;;  %v334_v26 = vld [vmem:[#allocation2 + $0x37] sm:$0xff]  ;;  %v2368_v33 = vpack.c.bf16 %v189_v24, %v189_v24  ;;  %v830_v37 = vadd.f32 %v808_v28, %v2297_v30  ;;  %v2387_v51 = vpack.c.bf16 %v191_v38, %v191_v38 }
  0xbf   :  { %159 = vst.msk [vmem:[#allocation2 + $0x98] sm:$0xff] %vm53_vm0, %v150_v22  ;;  %v2370_v34 = vpack.c.bf16 %v334_v26, %v334_v26  ;;  %v839_v39 = vmul.f32 0.25, %v831_v31  ;;  %v2379_v29 = vld [vmem:[#allocation2 + $0x51] sm:$0xff]  ;;  %v262_v30 = vld [vmem:[#allocation2 + $0x39] sm:$0xff] }
  0xc0   :  { %183 = vst.msk [vmem:[#allocation3 + $0x10] sm:$0xf] %vm178_vm3, %v2362_v27  ;;  %233 = vrot.lane.b32.xlu1 %v2366_v32, %s2166_s21  ;;  %231 = vrot.lane.b32.xlu0 %v2368_v33, %s2166_s21  ;;  %v838_v40 = vmul.f32 0.25, %v830_v37  ;;  %v812_v43 = vpop.permute.xlu1 %811  ;;  %v2435_v15 = vpack.c.bf16 %v262_v30, %v262_v30  ;;  %v2460_v28 = vpack.c.bf16 %v2379_v29, %v2379_v29 }
  0xc1   :  { %181 = vst.msk [vmem:[#allocation3 + $0x8] sm:$0xf] %vm178_vm3, %v2370_v34  ;;  %v410_v44 = vld [vmem:[#allocation2 + $0x80] sm:$0xff]  ;;  %v832_v46 = vadd.f32 %v812_v43, %v2301_v35  ;;  %v128_v49 = vpop.permute.xlu0 %127  ;;  %v2399_v35 = vld [vmem:[#allocation2 + $0x69] sm:$0xff] }
  0xc2   :  { %v167_v45 = vld [vmem:[#allocation2 + $0x7f] sm:$0xff]  ;;  %847 = vst.msk [vmem:[#allocation2 + $0x50] sm:$0xff] %vm53_vm0, %v839_v39  ;;  %v2385_v50 = vpack.c.bf16 %v410_v44, %v410_v44  ;;  %846 = vst.msk [vmem:[#allocation2 + $0x38] sm:$0xff] %vm53_vm0, %v838_v40  ;;  %v144_v54 = vadd.f32 %v128_v49, %v2305_v36 }
  0xc3   :  { %v2389_v52 = vpack.c.bf16 %v167_v45, %v167_v45  ;;  %v1022_v53 = vld [vmem:[#allocation2 + $0x1f] sm:$0xff]  ;;  %v840_v56 = vmul.f32 0.25, %v832_v46 }
  0xc4   :  { %v2393_v55 = vpack.c.bf16 %v1022_v53, %v1022_v53  ;;  %v339_v57 = vld [vmem:[#allocation2 + $0xaf] sm:$0xff]  ;;  %237 = vrot.lane.b32.xlu1 %v2385_v50, %s2166_s21  ;;  %235 = vrot.lane.b32.xlu0 %v2387_v51, %s2166_s21  ;;  %v152_v59 = vmul.f32 0.25, %v144_v54  ;;  %v816_v60 = vpop.permute.xlu1 %815 }
  0xc5   :  { %v412_v58 = vld [vmem:[#allocation2 + $0xb0] sm:$0xff]  ;;  %184 = vst.msk [vmem:[#allocation3 + $0x14] sm:$0xf] %vm178_vm3, %v2389_v52  ;;  %v814_v63 = vpop.permute.xlu0 %813  ;;  %v834_v0 = vadd.f32 %v816_v60, %v2309_v41  ;;  %v2407_v1 = vpack.c.bf16 %v339_v57, %v339_v57 }
  0xc6   :  { %v338_v61 = vld [vmem:[#allocation2 + $0x97] sm:$0xff]  ;;  %v2403_v62 = vpack.c.bf16 %v412_v58, %v412_v58  ;;  %848 = vst.msk [vmem:[#allocation2 + $0x68] sm:$0xff] %vm53_vm0, %v840_v56  ;;  %161 = vst.msk [vmem:[#allocation2 + $0xc8] sm:$0xff] %vm53_vm0, %v152_v59  ;;  %v833_v3 = vadd.f32 %v814_v63, %v2313_v42  ;;  %v2427_v42 = vld [vmem:[#allocation2 + $0x81] sm:$0xff] }
  0xc7   :  { %v411_v36 = vld [vmem:[#allocation2 + $0x98] sm:$0xff]  ;;  %871 = vst.msk [vmem:[#allocation3 + $0x24] sm:$0xf] %vm178_vm3, %v2393_v55  ;;  %v2415_v4 = vpack.c.bf16 %v338_v61, %v338_v61  ;;  %v842_v5 = vmul.f32 0.25, %v834_v0  ;;  %186 = vst.msk [vmem:[#allocation3 + $0x1c] sm:$0xf] %vm178_vm3, %v2407_v1 }
  0xc8   :  { %v2411_v2 = vpack.c.bf16 %v411_v36, %v411_v36  ;;  %v2419_v6 = vld [vmem:[#allocation2 + $0x99] sm:$0xff]  ;;  %241 = vrot.lane.b32.xlu1 %v2403_v62, %s2166_s21  ;;  %v841_v7 = vmul.f32 0.25, %v833_v3  ;;  %v820_v8 = vpop.permute.xlu1 %819  ;;  %v2443_v22 = vld [vmem:[#allocation2 + $0xb1] sm:$0xff] }
  0xc9   :  { %v1024_v41 = vld [vmem:[#allocation2 + $0x4f] sm:$0xff]  ;;  %185 = vst.msk [vmem:[#allocation3 + $0x18] sm:$0xf] %vm178_vm3, %v2415_v4  ;;  %v1023_v10 = vld [vmem:[#allocation2 + $0x37] sm:$0xff]  ;;  %v818_v11 = vpop.permute.xlu0 %817  ;;  %v836_v13 = vadd.f32 %v820_v8, %v2317_v47  ;;  %v2584_v8 = vpack.c.bf16 %v2427_v42, %v2427_v42 }
  0xca   :  { %239 = vrot.lane.b32.xlu0 %v2411_v2, %s2166_s21  ;;  %v2429_v9 = vpack.c.bf16 %v1024_v41, %v1024_v41  ;;  %850 = vst.msk [vmem:[#allocation2 + $0x98] sm:$0xff] %vm53_vm0, %v842_v5  ;;  %v2437_v17 = vpack.c.bf16 %v1023_v10, %v1023_v10  ;;  %849 = vst.msk [vmem:[#allocation2 + $0x80] sm:$0xff] %vm53_vm0, %v841_v7  ;;  %v835_v20 = vadd.f32 %v818_v11, %v2321_v48  ;;  %v880_v30 = vld [vmem:[#allocation2 + $0x38] sm:$0xff]  ;;  %v881_v46 = vld [vmem:[#allocation2 + $0x50] sm:$0xff] }
  0xcb   :  { %v844_v21 = vmul.f32 0.25, %v836_v13  ;;  %v952_v45 = vld [vmem:[#allocation2 + $0x39] sm:$0xff]  ;;  %v953_v53 = vld [vmem:[#allocation2 + $0x51] sm:$0xff] }
  0xcc   :  { %873 = vst.msk [vmem:[#allocation3 + $0x2c] sm:$0xf] %vm178_vm3, %v2429_v9  ;;  %302 = vrot.lane.b32.xlu1 %v1889_v12, %s2162_s7  ;;  %v843_v14 = vmul.f32 0.25, %v835_v20  ;;  %872 = vst.msk [vmem:[#allocation3 + $0x28] sm:$0xf] %vm178_vm3, %v2437_v17  ;;  %v1955_v54 = vpack.c.bf16 %v953_v53, %v953_v53 }
  0xcd   :  { %v1025_v47 = vld [vmem:[#allocation2 + $0x67] sm:$0xff]  ;;  %v228_v26 = vpop.permute.xlu0 %227  ;;  %v1470_v60 = vld [vmem:[#allocation7] sm:$0xf] }
  0xce   :  { %304 = vrot.lane.b32.xlu0 %v2435_v15, %s2162_s7  ;;  %v2450_v23 = vpack.c.bf16 %v1025_v47, %v1025_v47  ;;  %v2452_v48 = vld [vmem:[#allocation2 + $0xc8] sm:$0xff]  ;;  %252 = vst.msk [vmem:[#allocation3] sm:$0xf] %vm251_vm4, %v228_v26  ;;  %2037 = vmatprep.subr.msk.bf16.mxu0 %vm1511_vm6, %v1470_v60  ;;  %v1537_v61 = vsel %vm1511_vm6, %v1470_v60, 0  ;;  %v2609_v47 = vpack.c.bf16 %v2419_v6, %v2419_v6 }
  0xcf   :  { %v2454_v25 = vld [vmem:[#allocation2 + $0xc9] sm:$0xff]  ;;  %851 = vst.msk [vmem:[#allocation2 + $0xb0] sm:$0xff] %vm53_vm0, %v843_v14  ;;  %2038 = vmatprep.subr.msk.bf16.mxu1 %vm1511_vm6, %v1470_v60  ;;  %2018 = vmatpush3.bf16.xpose.msra.mxu0 %v1537_v61 }
  0xd0   :  { %v2456_v24 = vld [vmem:[#allocation2 + $0xc7] sm:$0xff]  ;;  %874 = vst.msk [vmem:[#allocation3 + $0x30] sm:$0xf] %vm178_vm3, %v2450_v23  ;;  %306 = vrot.lane.b32.xlu1 %v2460_v28, %s2162_s7  ;;  %2036 = vmatpush3.bf16.xpose.msra.mxu1 %v1537_v61 }
  0xd1   :  { %852 = vst.msk [vmem:[#allocation2 + $0xc8] sm:$0xff] %vm53_vm0, %v844_v21  ;;  %v1027_v31 = vld [vmem:[#allocation2 + $0x97] sm:$0xff]  ;;  %v919_v37 = vpop.permute.xlu0 %918  ;;  %v1241_v38 = vld [vmem:[#allocation2 + $0x7f] sm:$0xff]  ;;  %v1169_v57 = vld [vmem:[#allocation2 + $0x69] sm:$0xff] }
  0xd2   :  { %373 = vrot.lane.b32.xlu0 %v2352_v18, %s2167_s22  ;;  %v2471_v39 = vpack.c.bf16 %v1027_v31, %v1027_v31  ;;  %942 = vst.msk [vmem:[#allocation3 + $0x20] sm:$0xf] %vm251_vm4, %v919_v37  ;;  %v2474_v29 = vpack.c.bf16 %v1241_v38, %v1241_v38  ;;  %v1979_v58 = vpack.c.bf16 %v1169_v57, %v1169_v57  ;;  %v1313_v59 = vld [vmem:[#allocation2 + $0x80] sm:$0xff] }
  0xd3   :  { %v2571_v0 = vpack.c.bf16 %v1313_v59, %v1313_v59  ;;  %v1385_v42 = vld [vmem:[#allocation2 + $0x81] sm:$0xff]  ;;  %v956_v6 = vld [vmem:[#allocation2 + $0x99] sm:$0xff] }
  0xd4   :  { %876 = vst.msk [vmem:[#allocation3 + $0x38] sm:$0xf] %vm178_vm3, %v2471_v39  ;;  %375 = vrot.lane.b32.xlu1 %v2370_v34, %s2167_s22  ;;  %875 = vst.msk [vmem:[#allocation3 + $0x34] sm:$0xf] %vm178_vm3, %v2474_v29  ;;  %v2625_v38 = vpack.c.bf16 %v956_v6, %v956_v6 }
  0xd5   :  { %v301_v18 = vpop.permute.xlu0 %300 }
  0xd6   :  { %377 = vrot.lane.b32.xlu0 %v2346_v16, %s2167_s22  ;;  %v1028_v40 = vld [vmem:[#allocation2 + $0xaf] sm:$0xff]  ;;  %325 = vst.msk [vmem:[#allocation3] sm:$0xf] %vm324_vm5, %v301_v18 }
  0xd7   :  { %v2485_v43 = vpack.c.bf16 %v1028_v40, %v1028_v40  ;;  %v885_v14 = vld [vmem:[#allocation2 + $0xb0] sm:$0xff] }
  0xd8   :  { %379 = vrot.lane.b32.xlu1 %v2362_v27, %s2167_s22  ;;  %v1101_v60 = vld [vmem:[#allocation2 + $0xc8] sm:$0xff] }
  0xd9   :  { %877 = vst.msk [vmem:[#allocation3 + $0x3c] sm:$0xf] %vm178_vm3, %v2485_v43  ;;  %v991_v44 = vpop.permute.xlu0 %990 }
  0xda   :  { %446 = vrot.lane.b32.xlu0 %v2350_v19, %s2168_s23  ;;  %1014 = vst.msk [vmem:[#allocation3 + $0x20] sm:$0xf] %vm324_vm5, %v991_v44  ;;  %v2507_v19 = vpack.c.bf16 %v2399_v35, %v2399_v35 }
  0xdc   :  { %448 = vrot.lane.b32.xlu1 %v2368_v33, %s2168_s23 }
  0xde   :  { %450 = vrot.lane.b32.xlu0 %v2366_v32, %s2168_s23 }
  0xe0   :  { %452 = vrot.lane.b32.xlu1 %v2387_v51, %s2168_s23 }
  0xe2   :  { %519 = vrot.lane.b32.xlu0 %v1889_v12, %s2169_s24 }
  0xe4   :  { %521 = vrot.lane.b32.xlu1 %v2435_v15, %s2169_s24 }
  0xe6   :  { %523 = vrot.lane.b32.xlu0 %v2460_v28, %s2169_s24 }
  0xe8   :  { %525 = vrot.lane.b32.xlu1 %v2507_v19, %s2169_s24 }
  0xea   :  { %593 = vrot.lane.b32.xlu0 %v2370_v34, %s2170_s25  ;;  %v1946_v34 = vpack.c.bf16 %v880_v30, %v880_v30  ;;  %v957_v30 = vld [vmem:[#allocation2 + $0xb1] sm:$0xff] }
  0xec   :  { %595 = vrot.lane.b32.xlu1 %v2346_v16, %s2170_s25  ;;  %v879_v16 = vld [vmem:[#allocation2 + $0x20] sm:$0xff] }
  0xed   :  { %v1945_v49 = vpack.c.bf16 %v879_v16, %v879_v16 }
  0xee   :  { %597 = vrot.lane.b32.xlu0 %v2362_v27, %s2170_s25  ;;  %v1954_v27 = vpack.c.bf16 %v952_v45, %v952_v45  ;;  %v2649_v45 = vpack.c.bf16 %v957_v30, %v957_v30 }
  0xf0   :  { %599 = vrot.lane.b32.xlu1 %v2389_v52, %s2170_s25 }
  0xf2   :  { %666 = vrot.lane.b32.xlu0 %v2368_v33, %s2171_s26  ;;  %v1947_v33 = vpack.c.bf16 %v881_v46, %v881_v46 }
  0xf4   :  { %668 = vrot.lane.b32.xlu1 %v2366_v32, %s2171_s26  ;;  %v951_v32 = vld [vmem:[#allocation2 + $0x21] sm:$0xff] }
  0xf6   :  { %670 = vrot.lane.b32.xlu0 %v2387_v51, %s2171_s26  ;;  %v1953_v51 = vpack.c.bf16 %v951_v32, %v951_v32  ;;  %v1029_v32 = vld [vmem:[#allocation2 + $0xc7] sm:$0xff] }
  0xf7   :  { %v2679_v53 = vpack.c.bf16 %v1029_v32, %v1029_v32 }
  0xf8   :  { %672 = vrot.lane.b32.xlu1 %v2385_v50, %s2171_s26 }
  0xfa   :  { %922 = vrot.lane.b32.xlu0 %v1946_v34, %s2166_s21 }
  0xfc   :  { %920 = vrot.lane.b32.xlu1 %v1945_v49, %s2166_s21 }
  0xfe   :  { %994 = vrot.lane.b32.xlu0 %v1954_v27, %s2162_s7 }
 0x100   :  { %924 = vrot.lane.b32.xlu1 %v1947_v33, %s2166_s21 }
 0x102   :  { %1062 = vrot.lane.b32.xlu0 %v2393_v55, %s2167_s22  ;;  %v1097_v55 = vld [vmem:[#allocation2 + $0x68] sm:$0xff] }
 0x103   :  { %v1971_v56 = vpack.c.bf16 %v1097_v55, %v1097_v55 }
 0x104   :  { %992 = vrot.lane.b32.xlu1 %v1953_v51, %s2162_s7 }
 0x106   :  { %1066 = vrot.lane.b32.xlu0 %v2429_v9, %s2167_s22 }
 0x108   :  { %996 = vrot.lane.b32.xlu1 %v1955_v54, %s2162_s7 }
 0x10a   :  { %1134 = vrot.lane.b32.xlu0 %v1945_v49, %s2168_s23  ;;  %v2665_v49 = vpack.c.bf16 %v2456_v24, %v2456_v24 }
 0x10c   :  { %1064 = vrot.lane.b32.xlu1 %v2437_v17, %s2167_s22 }
 0x10e   :  { %1138 = vrot.lane.b32.xlu0 %v1947_v33, %s2168_s23 }
 0x110   :  { %1068 = vrot.lane.b32.xlu1 %v2450_v23, %s2167_s22 }
 0x112   :  { %1206 = vrot.lane.b32.xlu0 %v1953_v51, %s2169_s24 }
 0x114   :  { %1136 = vrot.lane.b32.xlu1 %v1946_v34, %s2168_s23 }
 0x116   :  { %1210 = vrot.lane.b32.xlu0 %v1955_v54, %s2169_s24 }
 0x118   :  { %1140 = vrot.lane.b32.xlu1 %v1971_v56, %s2168_s23 }
 0x11a   :  { %1278 = vrot.lane.b32.xlu0 %v2437_v17, %s2170_s25  ;;  %v2600_v17 = vpack.c.bf16 %v1385_v42, %v1385_v42 }
 0x11c   :  { %1208 = vrot.lane.b32.xlu1 %v1954_v27, %s2169_s24 }
 0x11e   :  { %1282 = vrot.lane.b32.xlu0 %v2450_v23, %s2170_s25 }
 0x120   :  { %1212 = vrot.lane.b32.xlu1 %v1979_v58, %s2169_s24 }
 0x122   :  { %1350 = vrot.lane.b32.xlu0 %v1946_v34, %s2171_s26 }
 0x124   :  { %1280 = vrot.lane.b32.xlu1 %v2429_v9, %s2170_s25  ;;  %v884_v9 = vld [vmem:[#allocation2 + $0x98] sm:$0xff] }
 0x125   :  { %v2592_v13 = vpack.c.bf16 %v884_v9, %v884_v9 }
 0x126   :  { %739 = vrot.lane.b32.xlu0 %v2435_v15, %s2172_s27 }
 0x128   :  { %1284 = vrot.lane.b32.xlu1 %v2474_v29, %s2170_s25 }
 0x12a   :  { %1354 = vrot.lane.b32.xlu0 %v1971_v56, %s2171_s26 }
 0x12c   :  { %1352 = vrot.lane.b32.xlu1 %v1947_v33, %s2171_s26 }
 0x12e   :  { %1422 = vrot.lane.b32.xlu0 %v1954_v27, %s2172_s27  ;;  %v230_v35 = vpop.permute.xlu1 %229 }
 0x12f   :  { %253 = vst.msk [vmem:[#allocation3 + $0x4] sm:$0xf] %vm251_vm4, %v230_v35 }
 0x130   :  { %741 = vrot.lane.b32.xlu1 %v2460_v28, %s2172_s27  ;;  %v2617_v28 = vpack.c.bf16 %v885_v14, %v885_v14 }
 0x132   :  { %743 = vrot.lane.b32.xlu0 %v2507_v19, %s2172_s27  ;;  %v234_v36 = vpop.permute.xlu1 %233  ;;  %v232_v63 = vpop.permute.xlu0 %231 }
 0x133   :  { %255 = vst.msk [vmem:[#allocation3 + $0xc] sm:$0xf] %vm251_vm4, %v234_v36  ;;  %254 = vst.msk [vmem:[#allocation3 + $0x8] sm:$0xf] %vm251_vm4, %v232_v63  ;;  %v2709_v36 = vpack.c.bf16 %v1101_v60, %v1101_v60 }
 0x134   :  { %1356 = vrot.lane.b32.xlu1 %v2571_v0, %s2171_s26 }
 0x136   :  { %926 = vrot.lane.b32.xlu0 %v1971_v56, %s2166_s21  ;;  %v238_v3 = vpop.permute.xlu1 %237  ;;  %v236_v5 = vpop.permute.xlu0 %235 }
 0x137   :  { %257 = vst.msk [vmem:[#allocation3 + $0x14] sm:$0xf] %vm251_vm4, %v238_v3  ;;  %256 = vst.msk [vmem:[#allocation3 + $0x10] sm:$0xf] %vm251_vm4, %v236_v5 }
 0x138   :  { %1424 = vrot.lane.b32.xlu1 %v1955_v54, %s2172_s27 }
 0x13a   :  { %1426 = vrot.lane.b32.xlu0 %v1979_v58, %s2172_s27  ;;  %v242_v41 = vpop.permute.xlu1 %241 }
 0x13b   :  { %259 = vst.msk [vmem:[#allocation3 + $0x1c] sm:$0xf] %vm251_vm4, %v242_v41  ;;  %v2725_v41 = vpack.c.bf16 %v2454_v25, %v2454_v25 }
 0x13c   :  { %v240_v7 = vpop.permute.xlu0 %239  ;;  %745 = vrot.lane.b32.xlu1 %v2584_v8, %s2172_s27 }
 0x13d   :  { %258 = vst.msk [vmem:[#allocation3 + $0x18] sm:$0xf] %vm251_vm4, %v240_v7 }
 0x13e   :  { %308 = vrot.lane.b32.xlu0 %v2507_v19, %s2162_s7  ;;  %v303_v10 = vpop.permute.xlu1 %302 }
 0x13f   :  { %326 = vst.msk [vmem:[#allocation3 + $0x4] sm:$0xf] %vm324_vm5, %v303_v10 }
 0x140   :  { %v305_v11 = vpop.permute.xlu0 %304  ;;  %928 = vrot.lane.b32.xlu1 %v2571_v0, %s2166_s21 }
 0x141   :  { %327 = vst.msk [vmem:[#allocation3 + $0x8] sm:$0xf] %vm324_vm5, %v305_v11 }
 0x142   :  { %930 = vrot.lane.b32.xlu0 %v2592_v13, %s2166_s21  ;;  %v307_v12 = vpop.permute.xlu1 %306 }
 0x143   :  { %328 = vst.msk [vmem:[#allocation3 + $0xc] sm:$0xf] %vm324_vm5, %v307_v12 }
 0x144   :  { %v374_v15 = vpop.permute.xlu0 %373  ;;  %1428 = vrot.lane.b32.xlu1 %v2600_v17, %s2172_s27 }
 0x145   :  { %398 = vst.msk [vmem:[#allocation3] sm:$0xf] %vm397_vm7, %v374_v15 }
 0x146   :  { %998 = vrot.lane.b32.xlu0 %v1979_v58, %s2162_s7  ;;  %v376_v20 = vpop.permute.xlu1 %375  ;;  %v2695_v58 = vpack.c.bf16 %v2452_v48, %v2452_v48 }
 0x147   :  { %399 = vst.msk [vmem:[#allocation3 + $0x4] sm:$0xf] %vm397_vm7, %v376_v20 }
 0x148   :  { %v378_v21 = vpop.permute.xlu0 %377  ;;  %310 = vrot.lane.b32.xlu1 %v2584_v8, %s2162_s7 }
 0x149   :  { %400 = vst.msk [vmem:[#allocation3 + $0x8] sm:$0xf] %vm397_vm7, %v378_v21 }
 0x14a   :  { %312 = vrot.lane.b32.xlu0 %v2609_v47, %s2162_s7  ;;  %v380_v23 = vpop.permute.xlu1 %379 }
 0x14b   :  { %401 = vst.msk [vmem:[#allocation3 + $0xc] sm:$0xf] %vm397_vm7, %v380_v23 }
 0x14c   :  { %v447_v26 = vpop.permute.xlu0 %446  ;;  %932 = vrot.lane.b32.xlu1 %v2617_v28, %s2166_s21 }
 0x14d   :  { %471 = vst.msk [vmem:[#allocation3] sm:$0xf] %vm470_vm8, %v447_v26 }
 0x14e   :  { %381 = vrot.lane.b32.xlu0 %v2389_v52, %s2167_s22  ;;  %v449_v31 = vpop.permute.xlu1 %448  ;;  %v2635_v52 = vpack.c.bf16 %v2443_v22, %v2443_v22 }
 0x14f   :  { %472 = vst.msk [vmem:[#allocation3 + $0x4] sm:$0xf] %vm470_vm8, %v449_v31 }
 0x150   :  { %v451_v37 = vpop.permute.xlu0 %450  ;;  %1000 = vrot.lane.b32.xlu1 %v2600_v17, %s2162_s7 }
 0x151   :  { %473 = vst.msk [vmem:[#allocation3 + $0x8] sm:$0xf] %vm470_vm8, %v451_v37 }
 0x152   :  { %1002 = vrot.lane.b32.xlu0 %v2625_v38, %s2162_s7  ;;  %v453_v18 = vpop.permute.xlu1 %452 }
 0x153   :  { %474 = vst.msk [vmem:[#allocation3 + $0xc] sm:$0xf] %vm470_vm8, %v453_v18 }
 0x154   :  { %v520_v40 = vpop.permute.xlu0 %519  ;;  %314 = vrot.lane.b32.xlu1 %v2635_v52, %s2162_s7 }
 0x155   :  { %544 = vst.msk [vmem:[#allocation3] sm:$0xf] %vm543_vm9, %v520_v40 }
 0x156   :  { %1070 = vrot.lane.b32.xlu0 %v2474_v29, %s2167_s22  ;;  %v522_v44 = vpop.permute.xlu1 %521 }
 0x157   :  { %545 = vst.msk [vmem:[#allocation3 + $0x4] sm:$0xf] %vm543_vm9, %v522_v44 }
 0x158   :  { %v524_v19 = vpop.permute.xlu0 %523  ;;  %383 = vrot.lane.b32.xlu1 %v2415_v4, %s2167_s22 }
 0x159   :  { %546 = vst.msk [vmem:[#allocation3 + $0x8] sm:$0xf] %vm543_vm9, %v524_v19 }
 0x15a   :  { %385 = vrot.lane.b32.xlu0 %v2407_v1, %s2167_s22  ;;  %v526_v22 = vpop.permute.xlu1 %525 }
 0x15b   :  { %547 = vst.msk [vmem:[#allocation3 + $0xc] sm:$0xf] %vm543_vm9, %v526_v22  ;;  %v2173_v22 = vmov 0  }
 0x15c   :  { %v594_v34 = vpop.permute.xlu0 %593  ;;  %1004 = vrot.lane.b32.xlu1 %v2649_v45, %s2162_s7 }
 0x15d   :  { %618 = vst.msk [vmem:[#allocation3] sm:$0xf] %vm617_vm10, %v594_v34  ;;  %2055 = vset.pattern.permute.xlu1 %v2173_v22 }
 0x15e   :  { %454 = vrot.lane.b32.xlu0 %v2385_v50, %s2168_s23  ;;  %v596_v29 = vpop.permute.xlu1 %595 }
 0x15f   :  { %619 = vst.msk [vmem:[#allocation3 + $0x4] sm:$0xf] %vm617_vm10, %v596_v29 }
 0x160   :  { %v598_v16 = vpop.permute.xlu0 %597  ;;  %1072 = vrot.lane.b32.xlu1 %v2471_v39, %s2167_s22 }
 0x161   :  { %620 = vst.msk [vmem:[#allocation3 + $0x8] sm:$0xf] %vm617_vm10, %v598_v16 }
 0x162   :  { %1074 = vrot.lane.b32.xlu0 %v2485_v43, %s2167_s22  ;;  %v600_v27 = vpop.permute.xlu1 %599 }
 0x163   :  { %621 = vst.msk [vmem:[#allocation3 + $0xc] sm:$0xf] %vm617_vm10, %v600_v27 }
 0x164   :  { %v667_v46 = vpop.permute.xlu0 %666  ;;  %387 = vrot.lane.b32.xlu1 %v2665_v49, %s2167_s22 }
 0x165   :  { %691 = vst.msk [vmem:[#allocation3] sm:$0xf] %vm690_vm11, %v667_v46 }
 0x166   :  { %1142 = vrot.lane.b32.xlu0 %v2571_v0, %s2168_s23  ;;  %v669_v50 = vpop.permute.xlu1 %668 }
 0x167   :  { %692 = vst.msk [vmem:[#allocation3 + $0x4] sm:$0xf] %vm690_vm11, %v669_v50 }
 0x168   :  { %v671_v33 = vpop.permute.xlu0 %670  ;;  %456 = vrot.lane.b32.xlu1 %v2411_v2, %s2168_s23 }
 0x169   :  { %693 = vst.msk [vmem:[#allocation3 + $0x8] sm:$0xf] %vm690_vm11, %v671_v33 }
 0x16a   :  { %458 = vrot.lane.b32.xlu0 %v2403_v62, %s2168_s23  ;;  %v673_v24 = vpop.permute.xlu1 %672 }
 0x16b   :  { %694 = vst.msk [vmem:[#allocation3 + $0xc] sm:$0xf] %vm690_vm11, %v673_v24 }
 0x16c   :  { %v923_v51 = vpop.permute.xlu0 %922  ;;  %1076 = vrot.lane.b32.xlu1 %v2679_v53, %s2167_s22 }
 0x16d   :  { %944 = vst.msk [vmem:[#allocation3 + $0x28] sm:$0xf] %vm251_vm4, %v923_v51 }
 0x16e   :  { %527 = vrot.lane.b32.xlu0 %v2584_v8, %s2169_s24  ;;  %v921_v54 = vpop.permute.xlu1 %920  ;;  %v1173_v8 = vld [vmem:[#allocation2 + $0xc9] sm:$0xff] }
 0x16f   :  { %943 = vst.msk [vmem:[#allocation3 + $0x24] sm:$0xf] %vm251_vm4, %v921_v54  ;;  %v1983_v10 = vpack.c.bf16 %v1173_v8, %v1173_v8 }
 0x170   :  { %v995_v55 = vpop.permute.xlu0 %994  ;;  %1144 = vrot.lane.b32.xlu1 %v2592_v13, %s2168_s23 }
 0x171   :  { %1016 = vst.msk [vmem:[#allocation3 + $0x28] sm:$0xf] %vm324_vm5, %v995_v55 }
 0x172   :  { %1146 = vrot.lane.b32.xlu0 %v2617_v28, %s2168_s23  ;;  %v925_v56 = vpop.permute.xlu1 %924 }
 0x173   :  { %945 = vst.msk [vmem:[#allocation3 + $0x2c] sm:$0xf] %vm251_vm4, %v925_v56 }
 0x174   :  { %v1063_v57 = vpop.permute.xlu0 %1062  ;;  %460 = vrot.lane.b32.xlu1 %v2695_v58, %s2168_s23 }
 0x175   :  { %1086 = vst.msk [vmem:[#allocation3 + $0x20] sm:$0xf] %vm397_vm7, %v1063_v57 }
 0x176   :  { %1214 = vrot.lane.b32.xlu0 %v2600_v17, %s2169_s24  ;;  %v993_v35 = vpop.permute.xlu1 %992 }
 0x177   :  { %1015 = vst.msk [vmem:[#allocation3 + $0x24] sm:$0xf] %vm324_vm5, %v993_v35 }
 0x178   :  { %v1067_v59 = vpop.permute.xlu0 %1066  ;;  %529 = vrot.lane.b32.xlu1 %v2609_v47, %s2169_s24 }
 0x179   :  { %1088 = vst.msk [vmem:[#allocation3 + $0x28] sm:$0xf] %vm397_vm7, %v1067_v59 }
 0x17a   :  { %531 = vrot.lane.b32.xlu0 %v2635_v52, %s2169_s24  ;;  %v997_v48 = vpop.permute.xlu1 %996 }
 0x17b   :  { %1017 = vst.msk [vmem:[#allocation3 + $0x2c] sm:$0xf] %vm324_vm5, %v997_v48 }
 0x17c   :  { %v1135_v61 = vpop.permute.xlu0 %1134  ;;  %1148 = vrot.lane.b32.xlu1 %v2709_v36, %s2168_s23 }
 0x17d   :  { %1158 = vst.msk [vmem:[#allocation3 + $0x20] sm:$0xf] %vm470_vm8, %v1135_v61 }
 0x17e   :  { %601 = vrot.lane.b32.xlu0 %v2415_v4, %s2170_s25  ;;  %v1065_v63 = vpop.permute.xlu1 %1064 }
 0x17f   :  { %1087 = vst.msk [vmem:[#allocation3 + $0x24] sm:$0xf] %vm397_vm7, %v1065_v63 }
 0x180   :  { %v1139_v0 = vpop.permute.xlu0 %1138  ;;  %1216 = vrot.lane.b32.xlu1 %v2625_v38, %s2169_s24 }
 0x181   :  { %1160 = vst.msk [vmem:[#allocation3 + $0x28] sm:$0xf] %vm470_vm8, %v1139_v0 }
 0x182   :  { %1218 = vrot.lane.b32.xlu0 %v2649_v45, %s2169_s24  ;;  %v1069_v3 = vpop.permute.xlu1 %1068 }
 0x183   :  { %1089 = vst.msk [vmem:[#allocation3 + $0x2c] sm:$0xf] %vm397_vm7, %v1069_v3 }
 0x184   :  { %v1207_v5 = vpop.permute.xlu0 %1206  ;;  %533 = vrot.lane.b32.xlu1 %v2725_v41, %s2169_s24 }
 0x185   :  { %1230 = vst.msk [vmem:[#allocation3 + $0x20] sm:$0xf] %vm543_vm9, %v1207_v5 }
 0x186   :  { %1286 = vrot.lane.b32.xlu0 %v2471_v39, %s2170_s25  ;;  %v1137_v4 = vpop.permute.xlu1 %1136  ;;  %v560_v39 = vld [vmem:[#allocation2 + $0xdf] sm:$0xff] }
 0x187   :  { %1159 = vst.msk [vmem:[#allocation3 + $0x24] sm:$0xf] %vm470_vm8, %v1137_v4 }
 0x188   :  { %v1211_v7 = vpop.permute.xlu0 %1210  ;;  %603 = vrot.lane.b32.xlu1 %v2407_v1, %s2170_s25  ;;  %v1927_v1 = vpack.c.bf16 %v560_v39, %v560_v39 }
 0x189   :  { %1232 = vst.msk [vmem:[#allocation3 + $0x28] sm:$0xf] %vm543_vm9, %v1211_v7 }
 0x18a   :  { %605 = vrot.lane.b32.xlu0 %v2665_v49, %s2170_s25  ;;  %v1141_v25 = vpop.permute.xlu1 %1140 }
 0x18b   :  { %1161 = vst.msk [vmem:[#allocation3 + $0x2c] sm:$0xf] %vm470_vm8, %v1141_v25 }
 0x18c   :  { %v1279_v9 = vpop.permute.xlu0 %1278  ;;  %1220 = vrot.lane.b32.xlu1 %v1983_v10, %s2169_s24 }
 0x18d   :  { %1302 = vst.msk [vmem:[#allocation3 + $0x20] sm:$0xf] %vm617_vm10, %v1279_v9 }
 0x18e   :  { %674 = vrot.lane.b32.xlu0 %v2411_v2, %s2171_s26  ;;  %v1209_v11 = vpop.permute.xlu1 %1208 }
 0x18f   :  { %1231 = vst.msk [vmem:[#allocation3 + $0x24] sm:$0xf] %vm543_vm9, %v1209_v11 }
 0x190   :  { %v1283_v42 = vpop.permute.xlu0 %1282  ;;  %1288 = vrot.lane.b32.xlu1 %v2485_v43, %s2170_s25 }
 0x191   :  { %1304 = vst.msk [vmem:[#allocation3 + $0x28] sm:$0xf] %vm617_vm10, %v1283_v42 }
 0x192   :  { %1290 = vrot.lane.b32.xlu0 %v2679_v53, %s2170_s25  ;;  %v1213_v12 = vpop.permute.xlu1 %1212 }
 0x193   :  { %1233 = vst.msk [vmem:[#allocation3 + $0x2c] sm:$0xf] %vm543_vm9, %v1213_v12 }
 0x194   :  { %v1351_v15 = vpop.permute.xlu0 %1350  ;;  %607 = vrot.lane.b32.xlu1 %v1927_v1, %s2170_s25 }
 0x195   :  { %1374 = vst.msk [vmem:[#allocation3 + $0x20] sm:$0xf] %vm690_vm11, %v1351_v15 }
 0x196   :  { %1358 = vrot.lane.b32.xlu0 %v2592_v13, %s2171_s26  ;;  %v1281_v2 = vpop.permute.xlu1 %1280  ;;  %v633_v13 = vld [vmem:[#allocation2 + $0xe0] sm:$0xff] }
 0x197   :  { %1303 = vst.msk [vmem:[#allocation3 + $0x24] sm:$0xf] %vm617_vm10, %v1281_v2 }
 0x198   :  { %v740_v17 = vpop.permute.xlu0 %739  ;;  %676 = vrot.lane.b32.xlu1 %v2403_v62, %s2171_s26  ;;  %v1935_v62 = vpack.c.bf16 %v633_v13, %v633_v13 }
 0x199   :  { %764 = vst.msk [vmem:[#allocation3] sm:$0xf] %vm763_vm12, %v740_v17 }
 0x19a   :  { %678 = vrot.lane.b32.xlu0 %v2695_v58, %s2171_s26  ;;  %v1285_v43 = vpop.permute.xlu1 %1284 }
 0x19b   :  { %1305 = vst.msk [vmem:[#allocation3 + $0x2c] sm:$0xf] %vm617_vm10, %v1285_v43 }
 0x19c   :  { %v1355_v20 = vpop.permute.xlu0 %1354  ;;  %1292 = vrot.lane.b32.xlu1 %v1927_v1, %s2170_s25 }
 0x19d   :  { %1376 = vst.msk [vmem:[#allocation3 + $0x28] sm:$0xf] %vm690_vm11, %v1355_v20 }
 0x19e   :  { %747 = vrot.lane.b32.xlu0 %v2609_v47, %s2172_s27  ;;  %v1353_v21 = vpop.permute.xlu1 %1352 }
 0x19f   :  { %1375 = vst.msk [vmem:[#allocation3 + $0x24] sm:$0xf] %vm690_vm11, %v1353_v21 }
 0x1a0   :  { %v1423_v14 = vpop.permute.xlu0 %1422  ;;  %1360 = vrot.lane.b32.xlu1 %v2617_v28, %s2171_s26 }
 0x1a1   :  { %1446 = vst.msk [vmem:[#allocation3 + $0x20] sm:$0xf] %vm763_vm12, %v1423_v14 }
 0x1a2   :  { %1362 = vrot.lane.b32.xlu0 %v2709_v36, %s2171_s26  ;;  %v742_v23 = vpop.permute.xlu1 %741 }
 0x1a3   :  { %765 = vst.msk [vmem:[#allocation3 + $0x4] sm:$0xf] %vm763_vm12, %v742_v23 }
 0x1a4   :  { %v744_v26 = vpop.permute.xlu0 %743  ;;  %680 = vrot.lane.b32.xlu1 %v1935_v62, %s2171_s26 }
 0x1a5   :  { %766 = vst.msk [vmem:[#allocation3 + $0x8] sm:$0xf] %vm763_vm12, %v744_v26 }
 0x1a6   :  { %1430 = vrot.lane.b32.xlu0 %v2625_v38, %s2172_s27  ;;  %v1357_v47 = vpop.permute.xlu1 %1356  ;;  %v706_v38 = vld [vmem:[#allocation2 + $0xe1] sm:$0xff] }
 0x1a7   :  { %1377 = vst.msk [vmem:[#allocation3 + $0x2c] sm:$0xf] %vm690_vm11, %v1357_v47 }
 0x1a8   :  { %v927_v6 = vpop.permute.xlu0 %926  ;;  %749 = vrot.lane.b32.xlu1 %v2635_v52, %s2172_s27  ;;  %v1943_v52 = vpack.c.bf16 %v706_v38, %v706_v38 }
 0x1a9   :  { %946 = vst.msk [vmem:[#allocation3 + $0x30] sm:$0xf] %vm251_vm4, %v927_v6 }
 0x1aa   :  { %751 = vrot.lane.b32.xlu0 %v2725_v41, %s2172_s27  ;;  %v1425_v28 = vpop.permute.xlu1 %1424  ;;  %v2057_v37 = vld [vmem:[#allocation3] sm:$0xff]  }
 0x1ab   :  { %1447 = vst.msk [vmem:[#allocation3 + $0x24] sm:$0xf] %vm763_vm12, %v1425_v28  ;;  %2019 = vmatprep.mubr.msk.bf16.mxu0 %vm1511_vm6, %v2057_v37 }
 0x1ac   :  { %v1427_v31 = vpop.permute.xlu0 %1426  ;;  %1364 = vrot.lane.b32.xlu1 %v1935_v62, %s2171_s26 }
 0x1ad   :  { %1448 = vst.msk [vmem:[#allocation3 + $0x28] sm:$0xf] %vm763_vm12, %v1427_v31 }
 0x1ae   :  { %1434 = vrot.lane.b32.xlu0 %v1983_v10, %s2172_s27  ;;  %v746_v18 = vpop.permute.xlu1 %745 }
 0x1af   :  { %767 = vst.msk [vmem:[#allocation3 + $0xc] sm:$0xf] %vm763_vm12, %v746_v18 }
 0x1b0   :  { %v309_v40 = vpop.permute.xlu0 %308  ;;  %1432 = vrot.lane.b32.xlu1 %v2649_v45, %s2172_s27  ;;  %v1668_v45 = vld [vmem:[#allocation9] sm:$0xff] }
 0x1b1   :  { %329 = vst.msk [vmem:[#allocation3 + $0x10] sm:$0xf] %vm324_vm5, %v309_v40 }
 0x1b2   :  { %v929_v44 = vpop.permute.xlu1 %928  ;;  %v2058_v30 = vld [vmem:[#allocation3 + $0x20] sm:$0xff]  }
 0x1b3   :  { %947 = vst.msk [vmem:[#allocation3 + $0x34] sm:$0xf] %vm251_vm4, %v929_v44  ;;  %2027 = vmatprep.mubr.msk.bf16.mxu1 %vm1511_vm6, %v2058_v30 }
 0x1b4   :  { %v931_v19 = vpop.permute.xlu0 %930  ;;  %753 = vrot.lane.b32.xlu1 %v1943_v52, %s2172_s27 }
 0x1b5   :  { %948 = vst.msk [vmem:[#allocation3 + $0x38] sm:$0xf] %vm251_vm4, %v931_v19 }
 0x1b6   :  { %v1429_v34 = vpop.permute.xlu1 %1428  ;;  %v2059_v16 = vld [vmem:[#allocation3 + $0x8] sm:$0xff]  }
 0x1b7   :  { %1449 = vst.msk [vmem:[#allocation3 + $0x2c] sm:$0xf] %vm763_vm12, %v1429_v34  ;;  %2020 = vmatmul.mubr.msk.bf16.vlgmr.msra.gmra.mrb[0].mxu0 %vm1511_vm6, %v2059_v16 }
 0x1b8   :  { %v999_v29 = vpop.permute.xlu0 %998  ;;  %1436 = vrot.lane.b32.xlu1 %v1943_v52, %s2172_s27 }
 0x1b9   :  { %1018 = vst.msk [vmem:[#allocation3 + $0x30] sm:$0xf] %vm324_vm5, %v999_v29 }
 0x1ba   :  { %v311_v27 = vpop.permute.xlu1 %310 }
 0x1bb   :  { %330 = vst.msk [vmem:[#allocation3 + $0x14] sm:$0xf] %vm324_vm5, %v311_v27 }
 0x1bc   :  { %v313_v46 = vpop.permute.xlu0 %312  ;;  %1671 = vperm.xlu1 %2055, %v1668_v45  }
 0x1bd   :  { %331 = vst.msk [vmem:[#allocation3 + $0x18] sm:$0xf] %vm324_vm5, %v313_v46 }
 0x1be   :  { %v933_v49 = vpop.permute.xlu1 %932  ;;  %v2060_v33 = vld [vmem:[#allocation3 + $0x28] sm:$0xff]  }
 0x1bf   :  { %949 = vst.msk [vmem:[#allocation3 + $0x3c] sm:$0xf] %vm251_vm4, %v933_v49  ;;  %2028 = vmatmul.mubr.msk.bf16.vlgmr.msra.gmra.mrb[0].mxu1 %vm1511_vm6, %v2060_v33 }
 0x1c0   :  { %v382_v50 = vpop.permute.xlu0 %381  ;;  %1712 = vperm.xlu1 %2055, %v1668_v45  }
 0x1c1   :  { %402 = vst.msk [vmem:[#allocation3 + $0x10] sm:$0xf] %vm397_vm7, %v382_v50 }
 0x1c2   :  { %v1001_v32 = vpop.permute.xlu1 %1000 }
 0x1c3   :  { %1019 = vst.msk [vmem:[#allocation3 + $0x34] sm:$0xf] %vm324_vm5, %v1001_v32 }
 0x1c4   :  { %v1003_v24 = vpop.permute.xlu0 %1002 }
 0x1c5   :  { %1020 = vst.msk [vmem:[#allocation3 + $0x38] sm:$0xf] %vm324_vm5, %v1003_v24 }
 0x1c6   :  { %v315_v51 = vpop.permute.xlu1 %314 }
 0x1c7   :  { %332 = vst.msk [vmem:[#allocation3 + $0x1c] sm:$0xf] %vm324_vm5, %v315_v51 }
 0x1c8   :  { %v1071_v53 = vpop.permute.xlu0 %1070 }
 0x1c9   :  { %1090 = vst.msk [vmem:[#allocation3 + $0x30] sm:$0xf] %vm397_vm7, %v1071_v53 }
 0x1ca   :  { %v384_v54 = vpop.permute.xlu1 %383 }
 0x1cb   :  { %403 = vst.msk [vmem:[#allocation3 + $0x14] sm:$0xf] %vm397_vm7, %v384_v54 }
 0x1cc   :  { %v386_v55 = vpop.permute.xlu0 %385 }
 0x1cd   :  { %404 = vst.msk [vmem:[#allocation3 + $0x18] sm:$0xf] %vm397_vm7, %v386_v55 }
 0x1ce   :  { %v1005_v56 = vpop.permute.xlu1 %1004 }
 0x1cf   :  { %1021 = vst.msk [vmem:[#allocation3 + $0x3c] sm:$0xf] %vm324_vm5, %v1005_v56 }
 0x1d0   :  { %v455_v57 = vpop.permute.xlu0 %454 }
 0x1d1   :  { %475 = vst.msk [vmem:[#allocation3 + $0x10] sm:$0xf] %vm470_vm8, %v455_v57 }
 0x1d2   :  { %v1073_v58 = vpop.permute.xlu1 %1072 }
 0x1d3   :  { %1091 = vst.msk [vmem:[#allocation3 + $0x34] sm:$0xf] %vm397_vm7, %v1073_v58 }
 0x1d4   :  { %v1075_v35 = vpop.permute.xlu0 %1074 }
 0x1d5   :  { %1092 = vst.msk [vmem:[#allocation3 + $0x38] sm:$0xf] %vm397_vm7, %v1075_v35 }
 0x1d6   :  { %v388_v59 = vpop.permute.xlu1 %387 }
 0x1d7   :  { %405 = vst.msk [vmem:[#allocation3 + $0x1c] sm:$0xf] %vm397_vm7, %v388_v59 }
 0x1d8   :  { %v1143_v60 = vpop.permute.xlu0 %1142 }
 0x1d9   :  { %1162 = vst.msk [vmem:[#allocation3 + $0x30] sm:$0xf] %vm470_vm8, %v1143_v60 }
 0x1da   :  { %v457_v48 = vpop.permute.xlu1 %456 }
 0x1db   :  { %476 = vst.msk [vmem:[#allocation3 + $0x14] sm:$0xf] %vm470_vm8, %v457_v48 }
 0x1dc   :  { %v459_v61 = vpop.permute.xlu0 %458 }
 0x1dd   :  { %477 = vst.msk [vmem:[#allocation3 + $0x18] sm:$0xf] %vm470_vm8, %v459_v61 }
 0x1de   :  { %v1077_v36 = vpop.permute.xlu1 %1076 }
 0x1df   :  { %1093 = vst.msk [vmem:[#allocation3 + $0x3c] sm:$0xf] %vm397_vm7, %v1077_v36 }
 0x1e0   :  { %v528_v63 = vpop.permute.xlu0 %527 }
 0x1e1   :  { %548 = vst.msk [vmem:[#allocation3 + $0x10] sm:$0xf] %vm543_vm9, %v528_v63 }
 0x1e2   :  { %v1145_v0 = vpop.permute.xlu1 %1144 }
 0x1e3   :  { %1163 = vst.msk [vmem:[#allocation3 + $0x34] sm:$0xf] %vm470_vm8, %v1145_v0 }
 0x1e4   :  { %v1147_v3 = vpop.permute.xlu0 %1146 }
 0x1e5   :  { %1164 = vst.msk [vmem:[#allocation3 + $0x38] sm:$0xf] %vm470_vm8, %v1147_v3 }
 0x1e6   :  { %v461_v5 = vpop.permute.xlu1 %460 }
 0x1e7   :  { %478 = vst.msk [vmem:[#allocation3 + $0x1c] sm:$0xf] %vm470_vm8, %v461_v5 }
 0x1e8   :  { %v1215_v41 = vpop.permute.xlu0 %1214 }
 0x1e9   :  { %1234 = vst.msk [vmem:[#allocation3 + $0x30] sm:$0xf] %vm543_vm9, %v1215_v41 }
 0x1ea   :  { %v530_v4 = vpop.permute.xlu1 %529 }
 0x1eb   :  { %549 = vst.msk [vmem:[#allocation3 + $0x14] sm:$0xf] %vm543_vm9, %v530_v4 }
 0x1ec   :  { %v532_v7 = vpop.permute.xlu0 %531 }
 0x1ed   :  { %550 = vst.msk [vmem:[#allocation3 + $0x18] sm:$0xf] %vm543_vm9, %v532_v7 }
 0x1ee   :  { %v1149_v8 = vpop.permute.xlu1 %1148 }
 0x1ef   :  { %1165 = vst.msk [vmem:[#allocation3 + $0x3c] sm:$0xf] %vm470_vm8, %v1149_v8 }
 0x1f0   :  { %v602_v25 = vpop.permute.xlu0 %601 }
 0x1f1   :  { %622 = vst.msk [vmem:[#allocation3 + $0x10] sm:$0xf] %vm617_vm10, %v602_v25 }
 0x1f2   :  { %v1217_v9 = vpop.permute.xlu1 %1216 }
 0x1f3   :  { %1235 = vst.msk [vmem:[#allocation3 + $0x34] sm:$0xf] %vm543_vm9, %v1217_v9 }
 0x1f4   :  { %v1219_v10 = vpop.permute.xlu0 %1218 }
 0x1f5   :  { %1236 = vst.msk [vmem:[#allocation3 + $0x38] sm:$0xf] %vm543_vm9, %v1219_v10 }
 0x1f6   :  { %v534_v39 = vpop.permute.xlu1 %533 }
 0x1f7   :  { %551 = vst.msk [vmem:[#allocation3 + $0x1c] sm:$0xf] %vm543_vm9, %v534_v39 }
 0x1f8   :  { %v1287_v11 = vpop.permute.xlu0 %1286 }
 0x1f9   :  { %1306 = vst.msk [vmem:[#allocation3 + $0x30] sm:$0xf] %vm617_vm10, %v1287_v11 }
 0x1fa   :  { %v604_v42 = vpop.permute.xlu1 %603 }
 0x1fb   :  { %623 = vst.msk [vmem:[#allocation3 + $0x14] sm:$0xf] %vm617_vm10, %v604_v42 }
 0x1fc   :  { %v606_v1 = vpop.permute.xlu0 %605 }
 0x1fd   :  { %624 = vst.msk [vmem:[#allocation3 + $0x18] sm:$0xf] %vm617_vm10, %v606_v1 }
 0x1fe   :  { %v1221_v12 = vpop.permute.xlu1 %1220 }
 0x1ff   :  { %1237 = vst.msk [vmem:[#allocation3 + $0x3c] sm:$0xf] %vm543_vm9, %v1221_v12 }
 0x200   :  { %v675_v15 = vpop.permute.xlu0 %674 }
 0x201   :  { %695 = vst.msk [vmem:[#allocation3 + $0x10] sm:$0xf] %vm690_vm11, %v675_v15 }
 0x202   :  { %v1289_v2 = vpop.permute.xlu1 %1288 }
 0x203   :  { %1307 = vst.msk [vmem:[#allocation3 + $0x34] sm:$0xf] %vm617_vm10, %v1289_v2 }
 0x204   :  { %v1291_v17 = vpop.permute.xlu0 %1290 }
 0x205   :  { %1308 = vst.msk [vmem:[#allocation3 + $0x38] sm:$0xf] %vm617_vm10, %v1291_v17 }
 0x206   :  { %v608_v43 = vpop.permute.xlu1 %607 }
 0x207   :  { %625 = vst.msk [vmem:[#allocation3 + $0x1c] sm:$0xf] %vm617_vm10, %v608_v43 }
 0x208   :  { %v1359_v20 = vpop.permute.xlu0 %1358 }
 0x209   :  { %1378 = vst.msk [vmem:[#allocation3 + $0x30] sm:$0xf] %vm690_vm11, %v1359_v20 }
 0x20a   :  { %v677_v13 = vpop.permute.xlu1 %676 }
 0x20b   :  { %696 = vst.msk [vmem:[#allocation3 + $0x14] sm:$0xf] %vm690_vm11, %v677_v13 }
 0x20c   :  { %v679_v21 = vpop.permute.xlu0 %678 }
 0x20d   :  { %697 = vst.msk [vmem:[#allocation3 + $0x18] sm:$0xf] %vm690_vm11, %v679_v21 }
 0x20e   :  { %v1293_v14 = vpop.permute.xlu1 %1292 }
 0x20f   :  { %1309 = vst.msk [vmem:[#allocation3 + $0x3c] sm:$0xf] %vm617_vm10, %v1293_v14 }
 0x210   :  { %v748_v62 = vpop.permute.xlu0 %747 }
 0x211   :  { %768 = vst.msk [vmem:[#allocation3 + $0x10] sm:$0xf] %vm763_vm12, %v748_v62 }
 0x212   :  { %v1361_v23 = vpop.permute.xlu1 %1360 }
 0x213   :  { %1379 = vst.msk [vmem:[#allocation3 + $0x34] sm:$0xf] %vm690_vm11, %v1361_v23 }
 0x214   :  { %v1363_v26 = vpop.permute.xlu0 %1362 }
 0x215   :  { %1380 = vst.msk [vmem:[#allocation3 + $0x38] sm:$0xf] %vm690_vm11, %v1363_v26 }
 0x216   :  { %v681_v47 = vpop.permute.xlu1 %680 }
 0x217   :  { %698 = vst.msk [vmem:[#allocation3 + $0x1c] sm:$0xf] %vm690_vm11, %v681_v47 }
 0x218   :  { %v1431_v6 = vpop.permute.xlu0 %1430 }
 0x219   :  { %1450 = vst.msk [vmem:[#allocation3 + $0x30] sm:$0xf] %vm763_vm12, %v1431_v6 }
 0x21a   :  { %v750_v28 = vpop.permute.xlu1 %749 }
 0x21b   :  { %769 = vst.msk [vmem:[#allocation3 + $0x14] sm:$0xf] %vm763_vm12, %v750_v28 }
 0x21c   :  { %v752_v31 = vpop.permute.xlu0 %751 }
 0x21d   :  { %770 = vst.msk [vmem:[#allocation3 + $0x18] sm:$0xf] %vm763_vm12, %v752_v31 }
 0x21e   :  { %v1365_v37 = vpop.permute.xlu1 %1364 }
 0x21f   :  { %1381 = vst.msk [vmem:[#allocation3 + $0x3c] sm:$0xf] %vm690_vm11, %v1365_v37 }
 0x220   :  { %v1435_v38 = vpop.permute.xlu0 %1434 }
 0x221   :  { %1452 = vst.msk [vmem:[#allocation3 + $0x38] sm:$0xf] %vm763_vm12, %v1435_v38 }
 0x222   :  { %v1433_v18 = vpop.permute.xlu1 %1432  ;;  %v2061_v40 = vld [vmem:[#allocation3 + $0x10] sm:$0xff]  }
 0x223   :  { %1451 = vst.msk [vmem:[#allocation3 + $0x34] sm:$0xf] %vm763_vm12, %v1433_v18  ;;  %2023 = vmatprep.mubr.msk.bf16.mxu0 %vm1511_vm6, %v2061_v40 }
 0x226   :  { %v754_v52 = vpop.permute.xlu1 %753 }
 0x227   :  { %771 = vst.msk [vmem:[#allocation3 + $0x1c] sm:$0xf] %vm763_vm12, %v754_v52 }
 0x22a   :  { %v1437_v44 = vpop.permute.xlu1 %1436  ;;  %v2062_v19 = vld [vmem:[#allocation3 + $0x30] sm:$0xff]  }
 0x22b   :  { %1453 = vst.msk [vmem:[#allocation3 + $0x3c] sm:$0xf] %vm763_vm12, %v1437_v44  ;;  %2031 = vmatprep.mubr.msk.bf16.mxu1 %vm1511_vm6, %v2062_v19 }
 0x22e   :  { %v2063_v30 = vld [vmem:[#allocation3 + $0x18] sm:$0xff]  }
 0x22f   :  { %2024 = vmatmul.mubr.msk.bf16.gmra.mrb[4].mxu0 %vm1511_vm6, %v2063_v30 }
 0x232   :  { %v2064_v34 = vld [vmem:[#allocation3 + $0x38] sm:$0xff]  }
 0x233   :  { %2032 = vmatmul.mubr.msk.bf16.gmra.mrb[4].mxu1 %vm1511_vm6, %v2064_v34 }
 0x23b   :  { %v1672_v58 = vpop.permute.xlu1 %1671 }
 0x23f   :  { %v1713_v35 = vpop.permute.xlu1 %1712 }
 0x28a   :  { %v2021_v29 = vpop.f32.mrb[0].mxu0 }
 0x28b   :  { %v1573_v16 = vpop.f32.mrb[1].mxu0 }
 0x28c   :  { %1636 = vxpose.xlu0.b32.start [1/8] (short) (narrow) %v1573_v16, 8  ;;  %v2022_v45 = vpop.f32.mrb[2].mxu0 }
 0x28d   :  { %v1576_v27 = vpop.f32.mrb[3].mxu0 }
 0x290   :  { %1637 = vxpose.xlu0.b32.cont [2/8] (short) (narrow) %v1576_v27, 8 }
 0x292   :  { %v2029_v46 = vpop.f32.mrb[0].mxu1 }
 0x293   :  { %v1605_v49 = vpop.f32.mrb[1].mxu1 }
 0x294   :  { %1677 = vxpose.xlu1.b32.start [1/8] (short) (narrow) %v1605_v49, 8  ;;  %v2030_v50 = vpop.f32.mrb[2].mxu1  ;;  %1638 = vxpose.xlu0.b32.cont [3/8] (short) (narrow) %v2021_v29, 8 }
 0x295   :  { %v1608_v33 = vpop.f32.mrb[3].mxu1 }
 0x298   :  { %1678 = vxpose.xlu1.b32.cont [2/8] (short) (narrow) %v1608_v33, 8  ;;  %1639 = vxpose.xlu0.b32.cont [4/8] (short) (narrow) %v2022_v45, 8 }
 0x29c   :  { %1679 = vxpose.xlu1.b32.cont [3/8] (short) (narrow) %v2029_v46, 8 }
 0x2a0   :  { %1680 = vxpose.xlu1.b32.cont [4/8] (short) (narrow) %v2030_v50, 8 }
 0x302   :  { %v2025_v32 = vpop.f32.mrb[4].mxu0 }
 0x303   :  { %v1589_v24 = vpop.f32.mrb[5].mxu0 }
 0x304   :  { %1640 = vxpose.xlu0.b32.cont [5/8] (short) (narrow) %v1589_v24, 8  ;;  %v2026_v51 = vpop.f32.mrb[6].mxu0 }
 0x305   :  { %v1592_v53 = vpop.f32.mrb[7].mxu0 }
 0x306   :  { %v2033_v54 = vpop.f32.mrb[4].mxu1 }
 0x307   :  { %v1621_v55 = vpop.f32.mrb[5].mxu1 }
 0x308   :  { %1681 = vxpose.xlu1.b32.cont [5/8] (short) (narrow) %v1621_v55, 8  ;;  %v2034_v56 = vpop.f32.mrb[6].mxu1  ;;  %1641 = vxpose.xlu0.b32.cont [6/8] (short) (narrow) %v1592_v53, 8 }
 0x309   :  { %v1624_v57 = vpop.f32.mrb[7].mxu1 }
 0x30c   :  { %1682 = vxpose.xlu1.b32.cont [6/8] (short) (narrow) %v1624_v57, 8  ;;  %1642 = vxpose.xlu0.b32.cont [7/8] (short) (narrow) %v2025_v32, 8 }
 0x310   :  { %1683 = vxpose.xlu1.b32.cont [7/8] (short) (narrow) %v2033_v54, 8  ;;  %1643 = vxpose.xlu0.b32.end [8/8] (short) (narrow) %v2026_v51, 8 }
 0x314   :  { %1684 = vxpose.xlu1.b32.end [8/8] (short) (narrow) %v2034_v56, 8 }
 0x339   :  { %2056 = vset.pattern.permute.xlu0 %v2173_v22 }
 0x374   :  { %v1652_v59 = vpop.trf.xlu0 }
 0x375   :  { %v1674_v60 = vadd.f32 %v1672_v58, %v1652_v59 }
 0x377   :  { %1676 = vst.msk [vmem:[#allocation10] sm:$0xff] %vm1675_vm13, %v1674_v60 }
 0x378   :  { %v1693_v48 = vpop.trf.xlu1 }
 0x379   :  { %v1715_v61 = vadd.f32 %v1713_v35, %v1693_v48 }
 0x37b   :  { %1717 = vst.msk [vmem:[#allocation10 + $0x8] sm:$0xff] %vm1675_vm13, %v1715_v61 }
 0x37c   :  { %2142 = shalt.err (!%p2139_p0)
}
 0x37d   :  { %s2143_s6 = scalar_lea.hbm %s2880_s3, 256 }
 0x37e   :  { %p2144_p1 = scmp.ne.s32.totalorder %s2880_s3, %s2143_s6  ;;  %p2147_p2 = scmp.lt.u32.totalorder %s2143_s6, %s2880_s3 }
 0x380   :  { %p2149_p3 = pnand %p2147_p2, %p2144_p1 }
 0x382   :  { %2152 = shalt.err (!%p2149_p3)
}
 0x383   :  { %1729 = dma.vmem_to_hbm [thread:$0]  %s1724_s29, 256, %s2880_s3, [#allocation6], %s2161_s1, %s2161_s1, %s2162_s7  }
 0x384   :  { %2157 = dma.done.wait [#allocation6], 256  }
 0x385   :  { %2158 = vsyncadd [#allocation6], 4294967040 }
 0x386   :  { %1733 = vsyncpa [#allocation5], 1 }
 0x387   :  { %1734 = vsyncpa [#allocation8], 1 }
 0x388   :  { %1735 = vsyncpa [#allocation6], 1 }

</bundles_post_ra>
